<compile_context>
chip_gen: v7x
topology: tpu7x:2x2x1
jax: 0.10.0
libtpu: 0.0.40
codegen_flags: <defaults>
</compile_context>

<pallas_src>
import functools

import jax
import jax.numpy as jnp
from jax.experimental import pallas as pl
from jax.experimental.pallas import tpu as pltpu


def _round_up(x, m):
    return ((x + m - 1) // m) * m


def _mlp_kernel(x_ref,
                w1, b1, w2, b2, w3, b3, w4, b4,   # encoder
                w5, b5, w6, b6, w7, b7,           # classifier
                o_ref):
    """Fused MLP on one batch tile: 7 matmuls + bias + ReLU / final sigmoid."""
    h = x_ref[...]  # bf16 (tile_b, D)

    def dense_relu(h, w_ref, b_ref):
        # bf16 MXU matmul with f32 accumulation; bias add in f32; ReLU after
        # the bf16 down-cast (numerically identical for ReLU, halves the VALU
        # epilogue cost on v6e/v7x bf16 VPU).
        z = jnp.dot(h, w_ref[...], preferred_element_type=jnp.float32) + b_ref[...]
        return jnp.maximum(z.astype(jnp.bfloat16), 0.0)

    # Encoder
    h = dense_relu(h, w1, b1)
    h = dense_relu(h, w2, b2)
    h = dense_relu(h, w3, b3)
    h = dense_relu(h, w4, b4)

    # Classifier (Dropout(0.2) is identity in eval mode)
    h = dense_relu(h, w5, b5)
    h = dense_relu(h, w6, b6)
    # Final layer: output dim zero-padded 1 -> 128 so the store is lane-dense
    # (unmasked); padded columns produce sigmoid(0)=0.5 and are sliced off on
    # the host.
    z = jnp.dot(h, w7[...], preferred_element_type=jnp.float32) + b7[...]
    o_ref[...] = jax.nn.sigmoid(z).astype(o_ref.dtype)


def prepare_params(params, compute_dtype=jnp.bfloat16):
    """Zero-pad all non-input feature widths to 128 lanes and cast weights to bf16.

    Zero padding is exact through ReLU (padded weights/biases are zero, so
    padded activations stay zero); the padded final-layer columns are removed
    on the host.  Biases stay f32, shaped (1, N) for in-kernel broadcasting.
    Call this ONCE at model-load time, not per forward.
    """
    n = len(params)
    widths = [params[0][0].shape[0]] + [w.shape[1] for w, _ in params]
    pw = [widths[0]] + [_round_up(w, 128) for w in widths[1:]]

    flat = []
    for i, (w, b) in enumerate(params):
        fin, fout = w.shape
        w_p = jnp.zeros((pw[i], pw[i + 1]), jnp.float32).at[:fin, :fout].set(
            w.astype(jnp.float32))
        b_p = jnp.zeros((pw[i + 1],), jnp.float32).at[:fout].set(
            b.astype(jnp.float32))
        flat.append(w_p.astype(compute_dtype))
        flat.append(b_p.reshape(1, -1))
    return tuple(flat)


def _default_tile_cap():
    """Per-generation batch-tile cap.

    v5e: 128-wide MXU is ~4.7x slower, so step overhead is already <10% at
    tile_b=512 and larger tiles only add batch-padding waste.
    v6e/v7x: 2048 amortizes the ~0.35us fixed per-grid-step overhead well
    below the per-tile MXU time.
    """
    try:
        kind = jax.devices()[0].device_kind.lower()
    except Exception:
        kind = ""
    if "v5 lite" in kind or "v5lite" in kind or "v5e" in kind:
        return 512
    return 2048


def _forward_impl(x, flat_params, *, tile_cap, min_steps=4):
    B, D = x.shape

    # Batch tile: as big as the cap allows, multiple of 8, but keep at least
    # `min_steps` grid steps so v7x's 2 TensorCores each get >= 2 steps
    # (megacore sharding + intra-core pipelining).
    tile_b = max(8, min(tile_cap, _round_up(pl.cdiv(B, min_steps), 8)))
    B_pad = _round_up(B, tile_b)
    if B_pad != B:
        x = jnp.pad(x, ((0, B_pad - B), (0, 0)))
    x = x.astype(jnp.bfloat16)  # halve x DMA; f32 accumulation in-kernel

    n_out = flat_params[-1].shape[-1]  # padded final width (128)

    # Parameters (<1 MiB in bf16) use constant index maps so they're DMA'd
    # once and stay resident in VMEM across grid steps.
    # TODO(synk): optionally pipeline_mode=pl.Buffered(1) on these to drop the
    # redundant second buffer once verified on the target jax version.
    param_specs = [pl.BlockSpec(p.shape, lambda i: (0, 0)) for p in flat_params]

    # Advisory cost for XLA's scheduler.
    layer_dims = [(p.shape[0], p.shape[1]) for p in flat_params[::2]]
    param_bytes = sum(p.size * p.dtype.itemsize for p in flat_params)
    flops = 2 * B_pad * sum(fi * fo for fi, fo in layer_dims)
    bytes_accessed = x.size * 2 + param_bytes + B_pad * n_out * 4
    cost = pl.CostEstimate(flops=flops, transcendentals=B_pad * n_out,
                           bytes_accessed=bytes_accessed)

    # Raise the scoped-VMEM limit only if the estimated footprint (double-
    # buffered x/out tiles + params + live activations) exceeds the smallest
    # default (16 MiB on v5e).
    est = (2 * tile_b * D * 2          # x tile, bf16, double-buffered
           + 2 * tile_b * n_out * 4    # out tile, f32, double-buffered
           + 2 * param_bytes
           + tile_b * 512 * 8)         # widest live activation, f32 + bf16
    vmem_limit = int(min(1.5 * est, 96 * 2 ** 20)) if est > 16 * 2 ** 20 else None

    out = pl.pallas_call(
        _mlp_kernel,
        out_shape=jax.ShapeDtypeStruct((B_pad, n_out), jnp.float32),
        grid_spec=pltpu.PrefetchScalarGridSpec(
            num_scalar_prefetch=0,
            grid=(B_pad // tile_b,),
            in_specs=[pl.BlockSpec((tile_b, D), lambda i: (i, 0))] + param_specs,
            out_specs=pl.BlockSpec((tile_b, n_out), lambda i: (i, 0)),
        ),
        compiler_params=pltpu.CompilerParams(
            dimension_semantics=("parallel",),
            vmem_limit_bytes=vmem_limit),
        cost_estimate=cost,
    )(x, *flat_params)
    return out[:B, :1]


def make_chen_encoder_mlp(params, *, tile_cap=None):
    """Prepare weights once (pad + bf16 cast) and return a jitted forward fn."""
    if tile_cap is None:
        tile_cap = _default_tile_cap()
    flat_params = prepare_params(params)
    fwd = jax.jit(functools.partial(_forward_impl, tile_cap=tile_cap))
    return lambda x: fwd(x, flat_params)


def init_params(key, input_dim):
    """Deterministic init mirroring nn.Linear default U(-1/sqrt(fan_in), +1/sqrt(fan_in)).

    Weights are stored (in, out); a PyTorch (out, in) weight would be transposed.
    """
    dims = [(input_dim, 512), (512, 384), (384, 256), (256, 128),
            (128, 100), (100, 100), (100, 1)]
    params = []
    for (fan_in, fan_out) in dims:
        key, kw, kb = jax.random.split(key, 3)
        bound = 1.0 / jnp.sqrt(jnp.float32(fan_in))
        w = jax.random.uniform(kw, (fan_in, fan_out), jnp.float32, -bound, bound)
        b = jax.random.uniform(kb, (fan_out,), jnp.float32, -bound, bound)
        params.append((w, b))
    return params


def reference_forward(x, params):
    """Pure-JAX f32 reference for correctness checking."""
    h = x
    for i, (w, b) in enumerate(params):
        h = h @ w + b
        if i < len(params) - 1:
            h = jnp.maximum(h, 0.0)
    return jax.nn.sigmoid(h)


if __name__ == "__main__":
    key = jax.random.PRNGKey(0)
    k_x, k_p = jax.random.split(key)

    # Small deterministic demo: non-multiple batch exercises padding and the
    # >=4-step grid (300 rows -> 4 tiles of 80).
    B, D = 300, 32
    x = jax.random.normal(k_x, (B, D), jnp.float32)
    params = init_params(k_p, D)

    forward = make_chen_encoder_mlp(params)
    out = jax.block_until_ready(forward(x))

    ref = reference_forward(x, params)
    assert out.shape == (B, 1)
    # bf16 matmul inputs with f32 accumulation -> loosened tolerance vs the
    # pure-f32 reference (observed error ~1e-3 at the sigmoid output).
    max_err = float(jnp.max(jnp.abs(out - ref)))
    assert max_err < 2e-2, f"mismatch vs reference: max abs err {max_err}"

    print("KERNEL_OK")
</pallas_src>

<mosaic_0001>
module attributes {stable_mosaic.version = 11 : i64} {
  func.func @_mlp_kernel(%arg0: i32, %arg1: memref<80x32xbf16, #tpu.memory_space<vmem>>, %arg2: memref<32x512xbf16, #tpu.memory_space<vmem>>, %arg3: memref<1x512xf32, #tpu.memory_space<vmem>>, %arg4: memref<512x384xbf16, #tpu.memory_space<vmem>>, %arg5: memref<1x384xf32, #tpu.memory_space<vmem>>, %arg6: memref<384x256xbf16, #tpu.memory_space<vmem>>, %arg7: memref<1x256xf32, #tpu.memory_space<vmem>>, %arg8: memref<256x128xbf16, #tpu.memory_space<vmem>>, %arg9: memref<1x128xf32, #tpu.memory_space<vmem>>, %arg10: memref<128x128xbf16, #tpu.memory_space<vmem>>, %arg11: memref<1x128xf32, #tpu.memory_space<vmem>>, %arg12: memref<128x128xbf16, #tpu.memory_space<vmem>>, %arg13: memref<1x128xf32, #tpu.memory_space<vmem>>, %arg14: memref<128x128xbf16, #tpu.memory_space<vmem>>, %arg15: memref<1x128xf32, #tpu.memory_space<vmem>>, %arg16: memref<80x128xf32, #tpu.memory_space<vmem>>) attributes {dimension_semantics = [#tpu.dimension_semantics<parallel>], iteration_bounds = array<i64: 4>, scalar_prefetch = 0 : i64, scratch_operands = 0 : i64, tpu.core_type = #tpu.core_type<tc>, window_params = [{transform_indices = @transform_0, window_bounds = array<i64: 80, 32>}, {pipeline_mode = #tpu.pipeline_mode<synchronous>, transform_indices = @transform_1, window_bounds = array<i64: 32, 512>}, {pipeline_mode = #tpu.pipeline_mode<synchronous>, transform_indices = @transform_2, window_bounds = array<i64: 1, 512>}, {pipeline_mode = #tpu.pipeline_mode<synchronous>, transform_indices = @transform_3, window_bounds = array<i64: 512, 384>}, {pipeline_mode = #tpu.pipeline_mode<synchronous>, transform_indices = @transform_4, window_bounds = array<i64: 1, 384>}, {pipeline_mode = #tpu.pipeline_mode<synchronous>, transform_indices = @transform_5, window_bounds = array<i64: 384, 256>}, {pipeline_mode = #tpu.pipeline_mode<synchronous>, transform_indices = @transform_6, window_bounds = array<i64: 1, 256>}, {pipeline_mode = #tpu.pipeline_mode<synchronous>, transform_indices = @transform_7, window_bounds = array<i64: 256, 128>}, {pipeline_mode = #tpu.pipeline_mode<synchronous>, transform_indices = @transform_8, window_bounds = array<i64: 1, 128>}, {pipeline_mode = #tpu.pipeline_mode<synchronous>, transform_indices = @transform_9, window_bounds = array<i64: 128, 128>}, {pipeline_mode = #tpu.pipeline_mode<synchronous>, transform_indices = @transform_10, window_bounds = array<i64: 1, 128>}, {pipeline_mode = #tpu.pipeline_mode<synchronous>, transform_indices = @transform_11, window_bounds = array<i64: 128, 128>}, {pipeline_mode = #tpu.pipeline_mode<synchronous>, transform_indices = @transform_12, window_bounds = array<i64: 1, 128>}, {pipeline_mode = #tpu.pipeline_mode<synchronous>, transform_indices = @transform_13, window_bounds = array<i64: 128, 128>}, {pipeline_mode = #tpu.pipeline_mode<synchronous>, transform_indices = @transform_14, window_bounds = array<i64: 1, 128>}, {transform_indices = @transform_15, window_bounds = array<i64: 80, 128>}]} {
    %c0 = arith.constant 0 : index
    %c0_0 = arith.constant 0 : index
    %0 = vector.load %arg1[%c0, %c0_0] : memref<80x32xbf16, #tpu.memory_space<vmem>>, vector<80x32xbf16>
    %c0_1 = arith.constant 0 : index
    %c0_2 = arith.constant 0 : index
    %1 = vector.load %arg2[%c0_1, %c0_2] : memref<32x512xbf16, #tpu.memory_space<vmem>>, vector<32x512xbf16>
    %cst = arith.constant dense<0.000000e+00> : vector<80x512xf32>
    %2 = tpu.matmul %0, %1, %cst {dimension_numbers = #tpu.dot_dimension_numbers<[1], [0], [0], [1], [0, 0, 1, 1], [], []>} : vector<80x32xbf16>, vector<32x512xbf16>, vector<80x512xf32> -> vector<80x512xf32>
    %c0_3 = arith.constant 0 : index
    %c0_4 = arith.constant 0 : index
    %3 = vector.load %arg3[%c0_3, %c0_4] : memref<1x512xf32, #tpu.memory_space<vmem>>, vector<1x512xf32>
    %4 = vector.broadcast %3 : vector<1x512xf32> to vector<80x512xf32>
    %5 = arith.addf %2, %4 : vector<80x512xf32>
    %6 = arith.truncf %5 : vector<80x512xf32> to vector<80x512xbf16>
    %cst_5 = arith.constant 0.000000e+00 : bf16
    %7 = vector.broadcast %cst_5 : bf16 to vector<80x512xbf16>
    %8 = arith.maximumf %6, %7 : vector<80x512xbf16>
    %c0_6 = arith.constant 0 : index
    %c0_7 = arith.constant 0 : index
    %9 = vector.load %arg4[%c0_6, %c0_7] : memref<512x384xbf16, #tpu.memory_space<vmem>>, vector<512x384xbf16>
    %cst_8 = arith.constant dense<0.000000e+00> : vector<80x384xf32>
    %10 = tpu.matmul %8, %9, %cst_8 {dimension_numbers = #tpu.dot_dimension_numbers<[1], [0], [0], [1], [0, 0, 1, 1], [], []>} : vector<80x512xbf16>, vector<512x384xbf16>, vector<80x384xf32> -> vector<80x384xf32>
    %c0_9 = arith.constant 0 : index
    %c0_10 = arith.constant 0 : index
    %11 = vector.load %arg5[%c0_9, %c0_10] : memref<1x384xf32, #tpu.memory_space<vmem>>, vector<1x384xf32>
    %12 = vector.broadcast %11 : vector<1x384xf32> to vector<80x384xf32>
    %13 = arith.addf %10, %12 : vector<80x384xf32>
    %14 = arith.truncf %13 : vector<80x384xf32> to vector<80x384xbf16>
    %cst_11 = arith.constant 0.000000e+00 : bf16
    %15 = vector.broadcast %cst_11 : bf16 to vector<80x384xbf16>
    %16 = arith.maximumf %14, %15 : vector<80x384xbf16>
    %c0_12 = arith.constant 0 : index
    %c0_13 = arith.constant 0 : index
    %17 = vector.load %arg6[%c0_12, %c0_13] : memref<384x256xbf16, #tpu.memory_space<vmem>>, vector<384x256xbf16>
    %cst_14 = arith.constant dense<0.000000e+00> : vector<80x256xf32>
    %18 = tpu.matmul %16, %17, %cst_14 {dimension_numbers = #tpu.dot_dimension_numbers<[1], [0], [0], [1], [0, 0, 1, 1], [], []>} : vector<80x384xbf16>, vector<384x256xbf16>, vector<80x256xf32> -> vector<80x256xf32>
    %c0_15 = arith.constant 0 : index
    %c0_16 = arith.constant 0 : index
    %19 = vector.load %arg7[%c0_15, %c0_16] : memref<1x256xf32, #tpu.memory_space<vmem>>, vector<1x256xf32>
    %20 = vector.broadcast %19 : vector<1x256xf32> to vector<80x256xf32>
    %21 = arith.addf %18, %20 : vector<80x256xf32>
    %22 = arith.truncf %21 : vector<80x256xf32> to vector<80x256xbf16>
    %cst_17 = arith.constant 0.000000e+00 : bf16
    %23 = vector.broadcast %cst_17 : bf16 to vector<80x256xbf16>
    %24 = arith.maximumf %22, %23 : vector<80x256xbf16>
    %c0_18 = arith.constant 0 : index
    %c0_19 = arith.constant 0 : index
    %25 = vector.load %arg8[%c0_18, %c0_19] : memref<256x128xbf16, #tpu.memory_space<vmem>>, vector<256x128xbf16>
    %cst_20 = arith.constant dense<0.000000e+00> : vector<80x128xf32>
    %26 = tpu.matmul %24, %25, %cst_20 {dimension_numbers = #tpu.dot_dimension_numbers<[1], [0], [0], [1], [0, 0, 1, 1], [], []>} : vector<80x256xbf16>, vector<256x128xbf16>, vector<80x128xf32> -> vector<80x128xf32>
    %c0_21 = arith.constant 0 : index
    %c0_22 = arith.constant 0 : index
    %27 = vector.load %arg9[%c0_21, %c0_22] : memref<1x128xf32, #tpu.memory_space<vmem>>, vector<1x128xf32>
    %28 = vector.broadcast %27 : vector<1x128xf32> to vector<80x128xf32>
    %29 = arith.addf %26, %28 : vector<80x128xf32>
    %30 = arith.truncf %29 : vector<80x128xf32> to vector<80x128xbf16>
    %cst_23 = arith.constant 0.000000e+00 : bf16
    %31 = vector.broadcast %cst_23 : bf16 to vector<80x128xbf16>
    %32 = arith.maximumf %30, %31 : vector<80x128xbf16>
    %c0_24 = arith.constant 0 : index
    %c0_25 = arith.constant 0 : index
    %33 = vector.load %arg10[%c0_24, %c0_25] : memref<128x128xbf16, #tpu.memory_space<vmem>>, vector<128x128xbf16>
    %cst_26 = arith.constant dense<0.000000e+00> : vector<80x128xf32>
    %34 = tpu.matmul %32, %33, %cst_26 {dimension_numbers = #tpu.dot_dimension_numbers<[1], [0], [0], [1], [0, 0, 1, 1], [], []>} : vector<80x128xbf16>, vector<128x128xbf16>, vector<80x128xf32> -> vector<80x128xf32>
    %c0_27 = arith.constant 0 : index
    %c0_28 = arith.constant 0 : index
    %35 = vector.load %arg11[%c0_27, %c0_28] : memref<1x128xf32, #tpu.memory_space<vmem>>, vector<1x128xf32>
    %36 = vector.broadcast %35 : vector<1x128xf32> to vector<80x128xf32>
    %37 = arith.addf %34, %36 : vector<80x128xf32>
    %38 = arith.truncf %37 : vector<80x128xf32> to vector<80x128xbf16>
    %cst_29 = arith.constant 0.000000e+00 : bf16
    %39 = vector.broadcast %cst_29 : bf16 to vector<80x128xbf16>
    %40 = arith.maximumf %38, %39 : vector<80x128xbf16>
    %c0_30 = arith.constant 0 : index
    %c0_31 = arith.constant 0 : index
    %41 = vector.load %arg12[%c0_30, %c0_31] : memref<128x128xbf16, #tpu.memory_space<vmem>>, vector<128x128xbf16>
    %cst_32 = arith.constant dense<0.000000e+00> : vector<80x128xf32>
    %42 = tpu.matmul %40, %41, %cst_32 {dimension_numbers = #tpu.dot_dimension_numbers<[1], [0], [0], [1], [0, 0, 1, 1], [], []>} : vector<80x128xbf16>, vector<128x128xbf16>, vector<80x128xf32> -> vector<80x128xf32>
    %c0_33 = arith.constant 0 : index
    %c0_34 = arith.constant 0 : index
    %43 = vector.load %arg13[%c0_33, %c0_34] : memref<1x128xf32, #tpu.memory_space<vmem>>, vector<1x128xf32>
    %44 = vector.broadcast %43 : vector<1x128xf32> to vector<80x128xf32>
    %45 = arith.addf %42, %44 : vector<80x128xf32>
    %46 = arith.truncf %45 : vector<80x128xf32> to vector<80x128xbf16>
    %cst_35 = arith.constant 0.000000e+00 : bf16
    %47 = vector.broadcast %cst_35 : bf16 to vector<80x128xbf16>
    %48 = arith.maximumf %46, %47 : vector<80x128xbf16>
    %c0_36 = arith.constant 0 : index
    %c0_37 = arith.constant 0 : index
    %49 = vector.load %arg14[%c0_36, %c0_37] : memref<128x128xbf16, #tpu.memory_space<vmem>>, vector<128x128xbf16>
    %cst_38 = arith.constant dense<0.000000e+00> : vector<80x128xf32>
    %50 = tpu.matmul %48, %49, %cst_38 {dimension_numbers = #tpu.dot_dimension_numbers<[1], [0], [0], [1], [0, 0, 1, 1], [], []>} : vector<80x128xbf16>, vector<128x128xbf16>, vector<80x128xf32> -> vector<80x128xf32>
    %c0_39 = arith.constant 0 : index
    %c0_40 = arith.constant 0 : index
    %51 = vector.load %arg15[%c0_39, %c0_40] : memref<1x128xf32, #tpu.memory_space<vmem>>, vector<1x128xf32>
    %52 = vector.broadcast %51 : vector<1x128xf32> to vector<80x128xf32>
    %53 = arith.addf %50, %52 : vector<80x128xf32>
    %54 = arith.negf %53 : vector<80x128xf32>
    %55 = math.exp %54 : vector<80x128xf32>
    %cst_41 = arith.constant 1.000000e+00 : f32
    %56 = vector.broadcast %cst_41 : f32 to vector<80x128xf32>
    %57 = arith.addf %56, %55 : vector<80x128xf32>
    %58 = arith.divf %56, %57 : vector<80x128xf32>
    %c0_42 = arith.constant 0 : index
    %c0_43 = arith.constant 0 : index
    %59 = vector.load %arg16[%c0_42, %c0_43] : memref<80x128xf32, #tpu.memory_space<vmem>>, vector<80x128xf32>
    tpu.vector_store %arg16[%c0_42, %c0_43], %58 {strides = array<i32>} : memref<80x128xf32, #tpu.memory_space<vmem>>, vector<80x128xf32>,
    return
  }
  func.func @transform_0(%arg0: i32) -> (i32, i32) {
    %c0_i32 = arith.constant 0 : i32
    %c0_i32_0 = arith.constant 0 : i32
    return %arg0, %c0_i32 : i32, i32
  }
  func.func @transform_1(%arg0: i32) -> (i32, i32) {
    %c0_i32 = arith.constant 0 : i32
    %c0_i32_0 = arith.constant 0 : i32
    %c0_i32_1 = arith.constant 0 : i32
    return %c0_i32, %c0_i32_0 : i32, i32
  }
  func.func @transform_2(%arg0: i32) -> (i32, i32) {
    %c0_i32 = arith.constant 0 : i32
    %c0_i32_0 = arith.constant 0 : i32
    %c0_i32_1 = arith.constant 0 : i32
    return %c0_i32, %c0_i32_0 : i32, i32
  }
  func.func @transform_3(%arg0: i32) -> (i32, i32) {
    %c0_i32 = arith.constant 0 : i32
    %c0_i32_0 = arith.constant 0 : i32
    %c0_i32_1 = arith.constant 0 : i32
    return %c0_i32, %c0_i32_0 : i32, i32
  }
  func.func @transform_4(%arg0: i32) -> (i32, i32) {
    %c0_i32 = arith.constant 0 : i32
    %c0_i32_0 = arith.constant 0 : i32
    %c0_i32_1 = arith.constant 0 : i32
    return %c0_i32, %c0_i32_0 : i32, i32
  }
  func.func @transform_5(%arg0: i32) -> (i32, i32) {
    %c0_i32 = arith.constant 0 : i32
    %c0_i32_0 = arith.constant 0 : i32
    %c0_i32_1 = arith.constant 0 : i32
    return %c0_i32, %c0_i32_0 : i32, i32
  }
  func.func @transform_6(%arg0: i32) -> (i32, i32) {
    %c0_i32 = arith.constant 0 : i32
    %c0_i32_0 = arith.constant 0 : i32
    %c0_i32_1 = arith.constant 0 : i32
    return %c0_i32, %c0_i32_0 : i32, i32
  }
  func.func @transform_7(%arg0: i32) -> (i32, i32) {
    %c0_i32 = arith.constant 0 : i32
    %c0_i32_0 = arith.constant 0 : i32
    %c0_i32_1 = arith.constant 0 : i32
    return %c0_i32, %c0_i32_0 : i32, i32
  }
  func.func @transform_8(%arg0: i32) -> (i32, i32) {
    %c0_i32 = arith.constant 0 : i32
    %c0_i32_0 = arith.constant 0 : i32
    %c0_i32_1 = arith.constant 0 : i32
    return %c0_i32, %c0_i32_0 : i32, i32
  }
  func.func @transform_9(%arg0: i32) -> (i32, i32) {
    %c0_i32 = arith.constant 0 : i32
    %c0_i32_0 = arith.constant 0 : i32
    %c0_i32_1 = arith.constant 0 : i32
    return %c0_i32, %c0_i32_0 : i32, i32
  }
  func.func @transform_10(%arg0: i32) -> (i32, i32) {
    %c0_i32 = arith.constant 0 : i32
    %c0_i32_0 = arith.constant 0 : i32
    %c0_i32_1 = arith.constant 0 : i32
    return %c0_i32, %c0_i32_0 : i32, i32
  }
  func.func @transform_11(%arg0: i32) -> (i32, i32) {
    %c0_i32 = arith.constant 0 : i32
    %c0_i32_0 = arith.constant 0 : i32
    %c0_i32_1 = arith.constant 0 : i32
    return %c0_i32, %c0_i32_0 : i32, i32
  }
  func.func @transform_12(%arg0: i32) -> (i32, i32) {
    %c0_i32 = arith.constant 0 : i32
    %c0_i32_0 = arith.constant 0 : i32
    %c0_i32_1 = arith.constant 0 : i32
    return %c0_i32, %c0_i32_0 : i32, i32
  }
  func.func @transform_13(%arg0: i32) -> (i32, i32) {
    %c0_i32 = arith.constant 0 : i32
    %c0_i32_0 = arith.constant 0 : i32
    %c0_i32_1 = arith.constant 0 : i32
    return %c0_i32, %c0_i32_0 : i32, i32
  }
  func.func @transform_14(%arg0: i32) -> (i32, i32) {
    %c0_i32 = arith.constant 0 : i32
    %c0_i32_0 = arith.constant 0 : i32
    %c0_i32_1 = arith.constant 0 : i32
    return %c0_i32, %c0_i32_0 : i32, i32
  }
  func.func @transform_15(%arg0: i32) -> (i32, i32) {
    %c0_i32 = arith.constant 0 : i32
    %c0_i32_0 = arith.constant 0 : i32
    return %arg0, %c0_i32 : i32, i32
  }
}

</mosaic_0001>

<bundles_post_ra>
// kernel: _forward_impl.1
= control target key start
LH: loop header
LB: loop body
LE: loop exit
PB: predicated region body
PF: predicated region fallthrough
CT: control target
= control target key end

     0   :  { %s5165_s0 = inlined_call_operand.vmem [shape: bf16[320,32], index: 0, kind: input, shape index: {}]   ;;  %s5166_s1 = inlined_call_operand.vmem [shape: bf16[32,512], index: 1, kind: input, shape index: {}]   ;;  %s5167_s2 = inlined_call_operand.vmem [shape: f32[1,512], index: 2, kind: input, shape index: {}]   ;;  %s5168_s3 = inlined_call_operand.hbm [shape: bf16[512,384], index: 3, kind: input, shape index: {}]   ;;  %s5169_s4 = inlined_call_operand.vmem [shape: f32[1,384], index: 4, kind: input, shape index: {}]   ;;  %s5170_s5 = inlined_call_operand.vmem [shape: bf16[384,256], index: 5, kind: input, shape index: {}]   ;;  %s5171_s6 = inlined_call_operand.vmem [shape: f32[1,256], index: 6, kind: input, shape index: {}]   ;;  %s5172_s7 = inlined_call_operand.vmem [shape: bf16[256,128], index: 7, kind: input, shape index: {}]   ;;  %s5173_s8 = inlined_call_operand.vmem [shape: f32[1,128], index: 8, kind: input, shape index: {}]   ;;  %s5174_s9 = inlined_call_operand.vmem [shape: bf16[128,128], index: 9, kind: input, shape index: {}]   ;;  %s5175_s10 = inlined_call_operand.vmem [shape: f32[1,128], index: 10, kind: input, shape index: {}]   ;;  %s5176_s11 = inlined_call_operand.hbm [shape: bf16[128,128], index: 11, kind: input, shape index: {}]   ;;  %s5177_s12 = inlined_call_operand.vmem [shape: f32[1,128], index: 12, kind: input, shape index: {}]   ;;  %s5178_s13 = inlined_call_operand.hbm [shape: bf16[128,128], index: 13, kind: input, shape index: {}]   ;;  %s5179_s14 = inlined_call_operand.vmem [shape: f32[1,128], index: 14, kind: input, shape index: {}]   ;;  %s5180_s15 = inlined_call_operand.vmem [shape: f32[320,128], index: 15, kind: output, shape index: {}]  }
   0x1   :  { %5186 = sst [smem:[#allocation9_spill]] %s5175_s10 }
   0x2   :  { %5187 = sst [smem:[#allocation10_spill]] %s5177_s12 }
   0x3   :  { %5188 = sst [smem:[#allocation11_spill]] %s5179_s14 }
   0x4   :  { %5189 = sst [smem:[#allocation12_spill]] %s5180_s15 }
   0x5   :  { %20 = vsyncpa [#allocation3], 0 }
   0x6   :  { %21 = vsyncpa [#allocation5], 0  ;;  %s4332_s18 = smov 0  }
   0x7 LB: > { %s4242_s19 = smov [#allocation4]   ;;  %s5181_s21 = sadd.s32 4294967295, %s4240_s18   ;;  %s4240_s18 = sphi %s4332_s18, %s27_s18  }
   0x8   : > { %s430_s20 = sshll.u32 %s4242_s19, 4  ;;  %p3184_p0 = scmp.ge.s32.totalorder %s4240_s18, 1  ;;  %s4350_s20 = int_to_ptr.vmem [resolvable:$true] %s430_s20 }
   0x9   : > { %p378_p1 = scmp.lt.s32.totalorder %s4240_s18, 5  ;;  %p4342_p2 = scmp.eq.s32.totalorder %s5181_s21, 0 }
   0xa   : > { %s4243_s24 = smov [#allocation2]   ;;  %s4244_s27 = smov [#allocation6]  }
   0xb   : > { %s5190_s22 = scalar_select %p4342_p2, 1, 0 }
   0xc   : > { %p4346_p3 = pnand %p3184_p0, %p378_p1  ;;  %s396_s25 = sshll.u32 %s4243_s24, 4  ;;  %s4354_s25 = int_to_ptr.vmem [resolvable:$true] %s396_s25 }
   0xd   : > { %s4362_s28 = sshll.u32 %s4244_s27, 4  ;;  %s4142_s16 = scalar_lea.hbm %s5176_s11, 1024  ;;  %s447_s28 = int_to_ptr.vmem [resolvable:$true] %s4362_s28 }
   0xe   : > { %s5191_s23 = scalar_select %p4346_p3, 1, 0 }
   0xf   : > { %p3811_p4 = pneg %p4346_p3  ;;  %p4143_p6 = scmp.ne.s32.totalorder %s5176_s11, %s4142_s16 }
  0x10   : > { %p4149_p10 = scmp.lt.u32.totalorder %s4142_s16, %s5176_s11 }
  0x11   : > { %p4358_p5 = pnand %p4342_p2, %p3811_p4 }
  0x13   : > { %p4372_p7 = pneg %p4358_p5 }
  0x15   : > { %p4145_p8 = pnand %p4372_p7, %p4143_p6 }
  0x17   : > { %p4146_p9 = pneg %p4145_p8 }
  0x19   : > { %p4151_p11 = pnand %p4149_p10, %p4146_p9 }
  0x1b   : > { %4154 = shalt.err (!%p4151_p11)
}
  0x1c   : > { %s4155_s29 = scalar_lea.vmem %s4350_s20, 1024  ;;  %p4163_p1 = scmp.lt.s32.totalorder %s4350_s20, %s4350_s20 }
  0x1d   : > { %p4156_p12 = scmp.ne.s32.totalorder %s4350_s20, %s4155_s29  ;;  %p4164_p4 = scmp.lt.s32.totalorder %s4155_s29, %s4155_s29 }
  0x1f   : > { %p4158_p13 = pnand %p4156_p12, %p4372_p7  ;;  %p4165_p6 = por %p4164_p4, %p4163_p1 }
  0x21   : > { %p4159_p0 = pneg %p4158_p13 }
  0x23   : > { %p4166_p8 = pnand %p4165_p6, %p4159_p0 }
  0x25   : > { %4169 = shalt.err (!%p4166_p8)
}
  0x26   : > { %s5182_s30 = smov 64   ;;  %s4246_s21 = smov 4  }
  0x27   : > { %3817 = dma.hbm_to_vmem [thread:$0]  (!%p4358_p5), %s5176_s11, 1024, %s4350_s20, [#allocation5], %s5182_s30, %s5182_s30, %s4246_s21  }
  0x28   : > { %s4170_s29 = scalar_lea.hbm %s5168_s3, 12288 }
  0x29   : > { %p4171_p9 = scmp.ne.s32.totalorder %s5168_s3, %s4170_s29  ;;  %p4177_p12 = scmp.lt.u32.totalorder %s4170_s29, %s5168_s3 }
  0x2b   : > { %p4173_p10 = pnand %p4171_p9, %p4372_p7 }
  0x2d   : > { %p4174_p11 = pneg %p4173_p10 }
  0x2f   : > { %p4179_p13 = pnand %p4177_p12, %p4174_p11 }
  0x31   : > { %4182 = shalt.err (!%p4179_p13)
}
  0x32   : > { %s4183_s20 = scalar_lea.vmem %s4354_s25, 12288  ;;  %p4191_p6 = scmp.lt.s32.totalorder %s4354_s25, %s4354_s25 }
  0x33   : > { %p4184_p0 = scmp.ne.s32.totalorder %s4354_s25, %s4183_s20  ;;  %p4192_p8 = scmp.lt.s32.totalorder %s4183_s20, %s4183_s20 }
  0x35   : > { %p4186_p1 = pnand %p4184_p0, %p4372_p7  ;;  %p4193_p9 = por %p4192_p8, %p4191_p6 }
  0x37   : > { %p4187_p4 = pneg %p4186_p1 }
  0x39   : > { %p4194_p10 = pnand %p4193_p9, %p4187_p4 }
  0x3b   : > { %4197 = shalt.err (!%p4194_p10)
}
  0x3c   : > { %s4247_s14 = smov 192   ;;  %s4248_s10 = smov 12  }
  0x3d   : > { %3814 = dma.hbm_to_vmem [thread:$0]  (!%p4358_p5), %s5168_s3, 12288, %s4354_s25, [#allocation3], %s4247_s14, %s4247_s14, %s4248_s10  }
  0x3e   : > { %s4198_s19 = scalar_lea.hbm %s5178_s13, 1024 }
  0x3f   : > { %p4199_p11 = scmp.ne.s32.totalorder %s5178_s13, %s4198_s19  ;;  %p4205_p0 = scmp.lt.u32.totalorder %s4198_s19, %s5178_s13 }
  0x41   : > { %p4201_p12 = pnand %p4199_p11, %p4372_p7 }
  0x43   : > { %p4202_p13 = pneg %p4201_p12 }
  0x45   : > { %p4207_p1 = pnand %p4205_p0, %p4202_p13 }
  0x47   : > { %4210 = shalt.err (!%p4207_p1)
}
  0x48   : > { %s4211_s12 = scalar_lea.vmem %s447_s28, 1024  ;;  %p4219_p9 = scmp.lt.s32.totalorder %s447_s28, %s447_s28 }
  0x49   : > { %p4212_p4 = scmp.ne.s32.totalorder %s447_s28, %s4211_s12  ;;  %p4220_p10 = scmp.lt.s32.totalorder %s4211_s12, %s4211_s12 }
  0x4b   : > { %p4214_p6 = pnand %p4212_p4, %p4372_p7  ;;  %p4221_p2 = por %p4220_p10, %p4219_p9 }
  0x4d   : > { %p4215_p8 = pneg %p4214_p6 }
  0x4f   : > { %p4222_p3 = pnand %p4221_p2, %p4215_p8 }
  0x51   : > { %4225 = shalt.err (!%p4222_p3)
}
  0x52   : > { %s5194_s25 = smov 64   ;;  %p5195_p11 = scmp.ne.s32.totalorder %s5191_s23, 0 }
  0x53   : > { %3820 = dma.hbm_to_vmem [thread:$0]  (!%p4358_p5), %s5178_s13, 1024, %s447_s28, [#allocation5], %s5194_s25, %s5194_s25, %s4246_s21  }
  0x54   : > { %474 = sbr.rel (%p5195_p11) target bundleno = 1812 (0x714), region = 80  ;;  %p5196_p7 = scmp.ne.s32.totalorder (!%p5195_p11), %s5190_s22, 0 }
  0x5b   : > { %4231 = dma.done.wait (%p5196_p7), [#allocation3], 12288  }
  0x5c   : > { %4233 = vsyncadd (%p5196_p7), [#allocation3], 4294955008 }
  0x5d   : > { %4235 = dma.done.wait (%p5196_p7), [#allocation5], 2048  }
  0x5e   : > { %4237 = vsyncadd (%p5196_p7), [#allocation5], 4294965248  ;;  %s5197_s26 = sadd.s32 4294967295, %s4240_s18   ;;  %v4249_v0 = vmov 0   ;;  %v3845_v1 = vld [vmem:[%s5166_s1 + $0x4] ss:$16 sps:$4 sm:$0xff]  }
  0x5f   : > { %s530_s24 = smul.u32 10, %s5197_s26  ;;  %696 = vmatprep.mubr.bf16.mxu0 %v4249_v0  ;;  %779 = vmatprep.mubr.bf16.mxu1 %v4249_v0  ;;  %v3847_v2 = vld [vmem:[%s5166_s1] ss:$16 sps:$4 sm:$0xff]   ;;  %v3848_v3 = vld [vmem:[%s5166_s1 + $0x24] ss:$16 sps:$4 sm:$0xff]   ;;  %vm648_vm0 = vcmask 261120  }
  0x60   : > { %664 = vmatprep.subr.bf16.mxu0 %v3845_v1  ;;  %v3850_v4 = vld [vmem:[%s5166_s1 + $0x20] ss:$16 sps:$4 sm:$0xff]   ;;  %v3856_v6 = vld [vmem:[%s5166_s1 + $0xc] ss:$16 sps:$4 sm:$0xff]   ;;  %v3858_v7 = vld [vmem:[%s5166_s1 + $0x8] ss:$16 sps:$4 sm:$0xff]   ;;  %v563_v1 = vlaneseq }
  0x61   : > { %p531_p2 = scmp.lt.s32.totalorder %s530_s24, 39  ;;  %665 = vmatpush1.bf16.msra.mxu0 %v3847_v2  ;;  %v3859_v8 = vld [vmem:[%s5166_s1 + $0x2c] ss:$16 sps:$4 sm:$0xff]   ;;  %747 = vmatprep.subr.bf16.mxu1 %v3856_v6  ;;  %v3861_v9 = vld [vmem:[%s5166_s1 + $0x28] ss:$16 sps:$4 sm:$0xff]   ;;  %vm4251_vm1 = vmmov 0  }
  0x62   : > { %666 = vmatprep.subr.bf16.mxu0 %v3848_v3  ;;  %748 = vmatpush1.bf16.msra.mxu1 %v3858_v7  ;;  %v3862_v10 = vld [vmem:[#allocation2] ss:$12 sps:$4 sm:$0xff]   ;;  %v3864_v11 = vld [vmem:[#allocation2 + $0x4] ss:$12 sps:$4 sm:$0xff]   ;;  %v3867_v12 = vld [vmem:[#allocation2 + $0x1c] ss:$12 sps:$4 sm:$0xff]  }
  0x63   : > { %s5203_s24 = smov (!%p531_p2, %s530_s24), 39  ;;  %749 = vmatprep.subr.bf16.mxu1 %v3859_v8  ;;  %v3865_v14 = vld [vmem:[#allocation2 + $0x18] ss:$12 sps:$4 sm:$0xff]   ;;  %v3870_v15 = vld [vmem:[#allocation2 + $0x34] ss:$12 sps:$4 sm:$0xff]   ;;  %v4510_v2 = vshrl.u32 %v563_v1, 7 }
  0x64   : > { %s3193_s23 = sshll.u32 %s5203_s24, 2  ;;  %v3868_v17 = vld [vmem:[#allocation2 + $0x30] ss:$12 sps:$4 sm:$0xff]   ;;  %v3873_v18 = vld [vmem:[#allocation2 + $0x4c] ss:$12 sps:$4 sm:$0xff]   ;;  %s5198_s22 = sld [smem:[#allocation9_spill]] }
  0x65   : > { %s4467_s17 = scalar_lea.vmem %s5165_s0, %s3193_s23  ;;  %667 = vmatpush1.bf16.msra.mxu0 %v3850_v4  ;;  %v3871_v19 = vld [vmem:[#allocation2 + $0x48] ss:$12 sps:$4 sm:$0xff]   ;;  %v3876_v22 = vld [vmem:[#allocation2 + $0x64] ss:$12 sps:$4 sm:$0xff]   ;;  %v3894_v23 = vld [vmem:[#allocation2 + $0xe0] ss:$12 sps:$4 sm:$0xff]  }
  0x66   : > { %v3851_v5 = vld [vmem:[%s4467_s17] sm:$0xff]   ;;  %1527 = vmatprep.subr.bf16.mxu0 %v3864_v11  ;;  %v3852_v13 = vld [vmem:[%s4467_s17 + $0x8] sm:$0xff]   ;;  %750 = vmatpush1.bf16.msra.mxu1 %v3861_v9  ;;  %v3853_v16 = vld [vmem:[%s4467_s17 + $0x10] sm:$0xff]   ;;  %v4513_v3 = vsub.s32 0, %v4510_v2  ;;  %s5200_s29 = sld [smem:[#allocation11_spill]]  ;;  %s3194_s20 = sshll.u32 %s5203_s24, 3 }
  0x67   : > { %v3889_v20 = vld [vmem:[#allocation2 + $0xc8] ss:$12 sps:$4 sm:$0xff]   ;;  %v3874_v24 = vld [vmem:[#allocation2 + $0x60] ss:$12 sps:$4 sm:$0xff]   ;;  %v3854_v25 = vld [vmem:[%s4467_s17 + $0x18] sm:$0xff]   ;;  %s5201_s30 = sld [smem:[#allocation12_spill]] }
  0x68   : > { %3208 = vmatmul.mubr.msk.bf16.vlgmr.msra.gmra.mrb[0].mxu0 %vm648_vm0, %v3851_v5  ;;  %v3890_v21 = vld [vmem:[#allocation2 + $0x8] ss:$12 sps:$4 sm:$0xff]   ;;  %3418 = vmatprep.subr.bf16.mxu1 %v3889_v20  ;;  %v3895_v27 = vld [vmem:[#allocation2 + $0x20] ss:$12 sps:$4 sm:$0xff]   ;;  %v3899_v28 = vld [vmem:[#allocation2 + $0xf8] ss:$12 sps:$4 sm:$0xff]  }
  0x69   : > { %706 = vmatprep.mubr.bf16.mxu0 %v4249_v0  ;;  %1528 = vmatpush1.bf16.msra.mxu0 %v3862_v10  ;;  %v3879_v26 = vld [vmem:[#allocation2 + $0x7c] ss:$12 sps:$4 sm:$0xff]   ;;  %v3877_v29 = vld [vmem:[#allocation2 + $0x78] ss:$12 sps:$4 sm:$0xff]   ;;  %v3882_v30 = vld [vmem:[#allocation2 + $0x94] ss:$12 sps:$4 sm:$0xff]  }
  0x6a   : > { %1529 = vmatprep.subr.bf16.mxu0 %v3867_v12  ;;  %3213 = vmatmul.mubr.msk.bf16.vlgmr.msra.gmra.mrb[0].mxu1 %vm648_vm0, %v3851_v5  ;;  %v3900_v31 = vld [vmem:[#allocation2 + $0x38] ss:$12 sps:$4 sm:$0xff]   ;;  %v3904_v32 = vld [vmem:[#allocation2 + $0x110] ss:$12 sps:$4 sm:$0xff]   ;;  %v3909_v36 = vld [vmem:[#allocation2 + $0x128] ss:$12 sps:$4 sm:$0xff]  }
  0x6b   : > { %789 = vmatprep.mubr.bf16.mxu1 %v4249_v0  ;;  %3419 = vmatpush3.bf16.msra.mxu1 %v3890_v21  ;;  %v3880_v33 = vld [vmem:[#allocation2 + $0x90] ss:$12 sps:$4 sm:$0xff]   ;;  %v3885_v34 = vld [vmem:[#allocation2 + $0xac] ss:$12 sps:$4 sm:$0xff]   ;;  %v3855_v37 = vld [vmem:[%s4467_s17 + $0x20] sm:$0xff]   ;;  %v4519_v5 = vsub.s32 1, %v4510_v2 }
  0x6c   : > { %3420 = vmatprep.subr.bf16.mxu1 %v3894_v23  ;;  %v3905_v35 = vld [vmem:[#allocation2 + $0x50] ss:$12 sps:$4 sm:$0xff]   ;;  %v3883_v38 = vld [vmem:[#allocation2 + $0xa8] ss:$12 sps:$4 sm:$0xff]   ;;  %v3914_v41 = vld [vmem:[#allocation2 + $0x140] ss:$12 sps:$4 sm:$0xff]  }
  0x6d   : > { %1530 = vmatpush1.bf16.msra.mxu0 %v3865_v14  ;;  %v3888_v39 = vld [vmem:[#allocation2 + $0xc4] ss:$12 sps:$4 sm:$0xff]   ;;  %v3910_v40 = vld [vmem:[#allocation2 + $0x68] ss:$12 sps:$4 sm:$0xff]   ;;  %v3886_v42 = vld [vmem:[#allocation2 + $0xc0] ss:$12 sps:$4 sm:$0xff]   ;;  %s5147_s14 = scalar_lea.vmem %s5201_s30, %s3194_s20 }
  0x6e   : > { %1531 = vmatprep.subr.bf16.mxu0 %v3870_v15  ;;  %v3893_v43 = vld [vmem:[#allocation2 + $0xdc] ss:$12 sps:$4 sm:$0xff]   ;;  %v3891_v44 = vld [vmem:[#allocation2 + $0xd8] ss:$12 sps:$4 sm:$0xff]   ;;  %v3898_v45 = vld [vmem:[#allocation2 + $0xf4] ss:$12 sps:$4 sm:$0xff]  }
  0x6f   : > { %3421 = vmatpush3.bf16.msra.mxu1 %v3895_v27  ;;  %v3896_v46 = vld [vmem:[#allocation2 + $0xf0] ss:$12 sps:$4 sm:$0xff]   ;;  %v3903_v47 = vld [vmem:[#allocation2 + $0x10c] ss:$12 sps:$4 sm:$0xff]   ;;  %v3901_v48 = vld [vmem:[#allocation2 + $0x108] ss:$12 sps:$4 sm:$0xff]  }
  0x70   : > { %3209 = vmatmul.mubr.msk.bf16.gmra.mrb[4].mxu0 %vm648_vm0, %v3852_v13  ;;  %3422 = vmatprep.subr.bf16.mxu1 %v3899_v28  ;;  %v3908_v49 = vld [vmem:[#allocation2 + $0x124] ss:$12 sps:$4 sm:$0xff]   ;;  %v3906_v50 = vld [vmem:[#allocation2 + $0x120] ss:$12 sps:$4 sm:$0xff]   ;;  %v3913_v51 = vld [vmem:[#allocation2 + $0x13c] ss:$12 sps:$4 sm:$0xff]  }
  0x71   : > { %716 = vmatprep.mubr.bf16.mxu0 %v4249_v0  ;;  %1532 = vmatpush1.bf16.msra.mxu0 %v3868_v17  ;;  %v3911_v52 = vld [vmem:[#allocation2 + $0x138] ss:$12 sps:$4 sm:$0xff]   ;;  %v3915_v53 = vld [vmem:[#allocation2 + $0x80] ss:$12 sps:$4 sm:$0xff]   ;;  %v3916_v55 = vld [vmem:[#allocation2 + $0x150] ss:$12 sps:$4 sm:$0xff]  }
  0x72   : > { %1533 = vmatprep.subr.bf16.mxu0 %v3873_v18  ;;  %3214 = vmatmul.mubr.msk.bf16.gmra.mrb[4].mxu1 %vm648_vm0, %v3852_v13  ;;  %v3918_v54 = vld [vmem:[#allocation2 + $0x154] ss:$12 sps:$4 sm:$0xff]   ;;  %v3919_v56 = vld [vmem:[#allocation2 + $0x158] ss:$12 sps:$4 sm:$0xff]   ;;  %v3924_v60 = vld [vmem:[#allocation2 + $0x170] ss:$12 sps:$4 sm:$0xff]  }
  0x73   : > { %799 = vmatprep.mubr.bf16.mxu1 %v4249_v0  ;;  %3423 = vmatpush3.bf16.msra.mxu1 %v3900_v31  ;;  %v3920_v57 = vld [vmem:[#allocation2 + $0x98] ss:$12 sps:$4 sm:$0xff]   ;;  %v3921_v59 = vld [vmem:[#allocation2 + $0x168] ss:$12 sps:$4 sm:$0xff]   ;;  %v3925_v61 = vld [vmem:[#allocation2 + $0xb0] ss:$12 sps:$4 sm:$0xff]  }
  0x74   : > { %3424 = vmatprep.subr.bf16.mxu1 %v3904_v32  ;;  %v3923_v58 = vld [vmem:[#allocation2 + $0x16c] ss:$12 sps:$4 sm:$0xff]   ;;  %v3928_v62 = vld [vmem:[#allocation2 + $0x184] ss:$12 sps:$4 sm:$0xff]   ;;  %v3935_v63 = vld [vmem:[#allocation2 + $0x248] ss:$12 sps:$4 sm:$0xff]  }
  0x75   : > { %1534 = vmatpush1.bf16.msra.mxu0 %v3871_v19  ;;  %v561_v4 = vld [vmem:[%s5167_s2] sm:$0xf]  ;;  %v573_v10 = vsub.s32 2, %v4510_v2  ;;  %v577_v12 = vsub.s32 3, %v4510_v2  ;;  %s5199_s17 = sld [smem:[#allocation10_spill]] }
  0x76   : > { %1535 = vmatprep.subr.bf16.mxu0 %v3876_v22  ;;  %v4522_v6 = vrot.slane %v561_v4, %v4513_v3  ;;  %v4525_v8 = vrot.slane %v561_v4, %v4519_v5  ;;  %v3940_v31 = vld [vmem:[#allocation2 + $0x260] ss:$12 sps:$4 sm:$0xff]  }
  0x77   : > { %3425 = vmatpush3.bf16.msra.mxu1 %v3905_v35  ;;  %v4535_v19 = vrot.slane %v561_v4, %v573_v10  ;;  %v4537_v21 = vrot.slane %v561_v4, %v577_v12 }
  0x78   : > { %3210 = vmatmul.mubr.msk.bf16.gmra.mrb[8].mxu0 %vm648_vm0, %v3853_v16  ;;  %3426 = vmatprep.subr.bf16.mxu1 %v3909_v36 }
  0x79   : > { %726 = vmatprep.mubr.bf16.mxu0 %v4249_v0  ;;  %1536 = vmatpush1.bf16.msra.mxu0 %v3874_v24  ;;  %v3926_v24 = vld [vmem:[#allocation2 + $0x180] ss:$12 sps:$4 sm:$0xff]  }
  0x7a   : > { %1537 = vmatprep.subr.bf16.mxu0 %v3879_v26  ;;  %3215 = vmatmul.mubr.msk.bf16.gmra.mrb[8].mxu1 %vm648_vm0, %v3853_v16 }
  0x7b   : > { %809 = vmatprep.mubr.bf16.mxu1 %v4249_v0  ;;  %3427 = vmatpush3.bf16.msra.mxu1 %v3910_v40 }
  0x7c   : > { %3428 = vmatprep.subr.bf16.mxu1 %v3914_v41 }
  0x7d   : > { %1538 = vmatpush1.bf16.msra.mxu0 %v3877_v29 }
  0x7e   : > { %1539 = vmatprep.subr.bf16.mxu0 %v3882_v30  ;;  %v3931_v30 = vld [vmem:[#allocation2 + $0x19c] ss:$12 sps:$4 sm:$0xff]  }
  0x7f   : > { %3429 = vmatpush3.bf16.msra.mxu1 %v3915_v53 }
  0x80   : > { %3211 = vmatmul.mubr.msk.bf16.gmra.mrb[12].mxu0 %vm648_vm0, %v3854_v25  ;;  %3430 = vmatprep.subr.bf16.mxu1 %v3919_v56  ;;  %v3946_v56 = vld [vmem:[#allocation2 + $0x1b8] ss:$12 sps:$4 sm:$0xff]  }
  0x81   : > { %736 = vmatprep.mubr.bf16.mxu0 %v4249_v0  ;;  %1540 = vmatpush1.bf16.msra.mxu0 %v3880_v33 }
  0x82   : > { %1541 = vmatprep.subr.bf16.mxu0 %v3885_v34  ;;  %3216 = vmatmul.mubr.msk.bf16.gmra.mrb[12].mxu1 %vm648_vm0, %v3854_v25  ;;  %v3936_v25 = vld [vmem:[#allocation2 + $0x188] ss:$12 sps:$4 sm:$0xff]  }
  0x83   : > { %819 = vmatprep.mubr.bf16.mxu1 %v4249_v0  ;;  %3431 = vmatpush3.bf16.msra.mxu1 %v3920_v57 }
  0x84   : > { %3432 = vmatprep.subr.bf16.mxu1 %v3924_v60  ;;  %v3939_v60 = vld [vmem:[#allocation2 + $0x1cc] ss:$12 sps:$4 sm:$0xff]  }
  0x85   : > { %1542 = vmatpush1.bf16.msra.mxu0 %v3883_v38 }
  0x86   : > { %1543 = vmatprep.subr.bf16.mxu0 %v3888_v39 }
  0x87   : > { %3433 = vmatpush3.bf16.msra.mxu1 %v3925_v61  ;;  %v3950_v61 = vld [vmem:[#allocation2 + $0x290] ss:$12 sps:$4 sm:$0xff]  }
  0x88   : > { %3212 = vmatmul.mubr.msk.bf16.gmra.mrb[16].mxu0 %vm648_vm0, %v3855_v37  ;;  %3464 = vmatprep.subr.bf16.mxu1 %v3935_v63 }
  0x89   : > { %1544 = vmatpush1.bf16.msra.mxu0 %v3886_v42 }
  0x8a   : > { %1545 = vmatprep.subr.bf16.mxu0 %v3893_v43  ;;  %3217 = vmatmul.mubr.msk.bf16.gmra.mrb[16].mxu1 %vm648_vm0, %v3855_v37  ;;  %v3929_v43 = vld [vmem:[#allocation2 + $0x198] ss:$12 sps:$4 sm:$0xff]  }
  0x8d   : > { %1546 = vmatpush1.bf16.msra.mxu0 %v3891_v44  ;;  %v3941_v44 = vld [vmem:[#allocation2 + $0x1a0] ss:$12 sps:$4 sm:$0xff]  }
  0x8e   : > { %1547 = vmatprep.subr.bf16.mxu0 %v3898_v45 }
  0x91   : > { %1548 = vmatpush1.bf16.msra.mxu0 %v3896_v46 }
  0x92   : > { %1549 = vmatprep.subr.bf16.mxu0 %v3903_v47  ;;  %v3934_v47 = vld [vmem:[#allocation2 + $0x1b4] ss:$12 sps:$4 sm:$0xff]  }
  0x95   : > { %1550 = vmatpush1.bf16.msra.mxu0 %v3901_v48  ;;  %v3945_v48 = vld [vmem:[#allocation2 + $0x278] ss:$12 sps:$4 sm:$0xff]  }
  0x96   : > { %1551 = vmatprep.subr.bf16.mxu0 %v3908_v49 }
  0x99   : > { %1552 = vmatpush1.bf16.msra.mxu0 %v3906_v50 }
  0x9a   : > { %1553 = vmatprep.subr.bf16.mxu0 %v3913_v51 }
  0x9d   : > { %1554 = vmatpush1.bf16.msra.mxu0 %v3911_v52 }
  0x9e   : > { %1555 = vmatprep.subr.bf16.mxu0 %v3918_v54  ;;  %v3932_v54 = vld [vmem:[#allocation2 + $0x1b0] ss:$12 sps:$4 sm:$0xff]  }
  0xa1   : > { %1556 = vmatpush1.bf16.msra.mxu0 %v3916_v55 }
  0xa2   : > { %1557 = vmatprep.subr.bf16.mxu0 %v3923_v58 }
  0xa5   : > { %1558 = vmatpush1.bf16.msra.mxu0 %v3921_v59 }
  0xa6   : > { %1610 = vmatprep.subr.bf16.mxu0 %v3928_v62 }
 0x13b   : > { %v698_v7 = vpop.f32.mrb[0].mxu0 }
 0x13c   : > { %v700_v9 = vpop.f32.mrb[1].mxu0  ;;  %v699_v13 = vadd.f32 %v698_v7, %v4522_v6 }
 0x13d   : > { %v702_v11 = vpop.f32.mrb[2].mxu0  ;;  %v701_v16 = vadd.f32 %v700_v9, %v4525_v8  ;;  %v781_v26 = vpop.f32.mrb[0].mxu1 }
 0x13e   : > { %v703_v14 = vadd.f32 %v702_v11, %v4522_v6  ;;  %v704_v15 = vpop.f32.mrb[3].mxu0  ;;  %v4543_v32 = vadd.f32 %v781_v26, %v4535_v19  ;;  %v783_v33 = vpop.f32.mrb[1].mxu1 }
 0x13f   : > { %v705_v17 = vadd.f32 %v704_v15, %v4525_v8  ;;  %v4547_v36 = vadd.f32 %v783_v33, %v4537_v21  ;;  %v785_v37 = vpop.f32.mrb[2].mxu1 }
 0x140   : > { %v830_v18 = vpack.c.bf16 %v703_v14, %v699_v13  ;;  %v4551_v40 = vadd.f32 %v785_v37, %v4535_v19  ;;  %v787_v41 = vpop.f32.mrb[3].mxu1  ;;  %v3949_v37 = vld [vmem:[#allocation2 + $0x1fc] ss:$12 sps:$4 sm:$0xff]  }
 0x141   : > { %v831_v20 = vpack.c.bf16 %v705_v17, %v701_v16  ;;  %v4555_v45 = vadd.f32 %v787_v41, %v4537_v21  ;;  %v3937_v16 = vld [vmem:[#allocation2 + $0x1c8] ss:$12 sps:$4 sm:$0xff]   ;;  %v3951_v17 = vld [vmem:[#allocation2 + $0x1d0] ss:$12 sps:$4 sm:$0xff]  }
 0x142   : > { %v850_v27 = vmax.bf16 %v4249_v0, %v830_v18  ;;  %v832_v49 = vpack.c.bf16 %v4551_v40, %v4543_v32  ;;  %v3978_v40 = vld [vmem:[#allocation2 + $0x2a0] ss:$12 sps:$4 sm:$0xff]  }
 0x143   : > { %v708_v22 = vpop.f32.mrb[4].mxu0  ;;  %v851_v23 = vmax.bf16 %v4249_v0, %v831_v20  ;;  %v833_v51 = vpack.c.bf16 %v4555_v45, %v4547_v36  ;;  %v3967_v36 = vld [vmem:[#allocation2 + $0x258] ss:$12 sps:$4 sm:$0xff]  }
 0x144   : > { %v709_v28 = vadd.f32 %v708_v22, %v4522_v6  ;;  %v710_v29 = vpop.f32.mrb[5].mxu0  ;;  %v3944_v22 = vld [vmem:[#allocation2 + $0x1e4] ss:$12 sps:$4 sm:$0xff]  }
 0x145   : > { %v711_v34 = vadd.f32 %v710_v29, %v4525_v8  ;;  %v712_v35 = vpop.f32.mrb[6].mxu0  ;;  %1559 = vmatprep.mubr.bf16.mxu0 %v851_v23  ;;  %1725 = vmatprep.mubr.bf16.mxu1 %v851_v23  ;;  %v791_v57 = vpop.f32.mrb[4].mxu1  ;;  %v3955_v23 = vld [vmem:[#allocation2 + $0x2a8] ss:$12 sps:$4 sm:$0xff]   ;;  %v3942_v29 = vld [vmem:[#allocation2 + $0x1e0] ss:$12 sps:$4 sm:$0xff]  }
 0x146   : > { %v713_v38 = vadd.f32 %v712_v35, %v4522_v6  ;;  %v714_v39 = vpop.f32.mrb[7].mxu0  ;;  %1560 = vmatmul.mubr.bf16.vlgmr.msra.gmra.mrb[20].mxu0 %v850_v27  ;;  %1726 = vmatmul.mubr.bf16.vlgmr.msra.gmra.mrb[20].mxu1 %v850_v27  ;;  %v4565_v62 = vadd.f32 %v791_v57, %v4535_v19  ;;  %v793_v63 = vpop.f32.mrb[5].mxu1 }
 0x147   : > { %v715_v42 = vadd.f32 %v714_v39, %v4525_v8  ;;  %1611 = vmatpush1.bf16.msra.mxu0 %v3926_v24  ;;  %3465 = vmatpush3.bf16.msra.mxu1 %v3936_v25  ;;  %v4569_v7 = vadd.f32 %v793_v63, %v4537_v21  ;;  %v795_v9 = vpop.f32.mrb[6].mxu1 }
 0x148   : > { %v834_v46 = vpack.c.bf16 %v713_v38, %v709_v28  ;;  %1612 = vmatprep.subr.bf16.mxu0 %v3931_v30  ;;  %3466 = vmatprep.subr.bf16.mxu1 %v3940_v31  ;;  %v4573_v13 = vadd.f32 %v795_v9, %v4535_v19  ;;  %v797_v14 = vpop.f32.mrb[7].mxu1  ;;  %v3956_v31 = vld [vmem:[#allocation2 + $0x1e8] ss:$12 sps:$4 sm:$0xff]   ;;  %v3960_v38 = vld [vmem:[#allocation2 + $0x2c0] ss:$12 sps:$4 sm:$0xff]  }
 0x149   : > { %v835_v50 = vpack.c.bf16 %v715_v42, %v711_v34  ;;  %v4577_v18 = vadd.f32 %v797_v14, %v4537_v21  ;;  %v3952_v9 = vld [vmem:[#allocation2 + $0x210] ss:$12 sps:$4 sm:$0xff]  }
 0x14a   : > { %v854_v52 = vmax.bf16 %v4249_v0, %v834_v46  ;;  %v836_v24 = vpack.c.bf16 %v4573_v13, %v4565_v62  ;;  %v3984_v13 = vld [vmem:[#allocation2 + $0x2d0] ss:$12 sps:$4 sm:$0xff]  }
 0x14b   : > { %1613 = vmatpush1.bf16.msra.mxu0 %v3929_v43  ;;  %v718_v53 = vpop.f32.mrb[8].mxu0  ;;  %v855_v55 = vmax.bf16 %v4249_v0, %v835_v50  ;;  %3467 = vmatpush3.bf16.msra.mxu1 %v3941_v44  ;;  %v837_v26 = vpack.c.bf16 %v4577_v18, %v4569_v7  ;;  %v3983_v7 = vld [vmem:[#allocation2 + $0x2bc] ss:$12 sps:$4 sm:$0xff]   ;;  %v3981_v18 = vld [vmem:[#allocation2 + $0x2b8] ss:$12 sps:$4 sm:$0xff]  }
 0x14c   : > { %v719_v58 = vadd.f32 %v718_v53, %v4522_v6  ;;  %v720_v59 = vpop.f32.mrb[9].mxu0  ;;  %1614 = vmatprep.subr.bf16.mxu0 %v3934_v47  ;;  %3468 = vmatprep.subr.bf16.mxu1 %v3945_v48  ;;  %v856_v32 = vmax.bf16 %v4249_v0, %v836_v24 }
 0x14d   : > { %v721_v1 = vadd.f32 %v720_v59, %v4525_v8  ;;  %v722_v4 = vpop.f32.mrb[10].mxu0  ;;  %1733 = vmatprep.mubr.bf16.mxu1 %v855_v55  ;;  %1569 = vmatprep.mubr.bf16.mxu0 %v855_v55  ;;  %v801_v33 = vpop.f32.mrb[8].mxu1  ;;  %v3961_v55 = vld [vmem:[#allocation2 + $0x200] ss:$12 sps:$4 sm:$0xff]   ;;  %v3965_v59 = vld [vmem:[#allocation2 + $0x2d8] ss:$12 sps:$4 sm:$0xff]  }
 0x14e   : > { %v723_v11 = vadd.f32 %v722_v4, %v4522_v6  ;;  %v724_v12 = vpop.f32.mrb[11].mxu0  ;;  %1734 = vmatmul.mubr.bf16.gmra.mrb[24].mxu1 %v854_v52  ;;  %1570 = vmatmul.mubr.bf16.gmra.mrb[24].mxu0 %v854_v52  ;;  %v4587_v39 = vadd.f32 %v801_v33, %v4535_v19  ;;  %v803_v41 = vpop.f32.mrb[9].mxu1 }
 0x14f   : > { %v725_v15 = vadd.f32 %v724_v12, %v4525_v8  ;;  %1615 = vmatpush1.bf16.msra.mxu0 %v3932_v54  ;;  %3469 = vmatpush3.bf16.msra.mxu1 %v3946_v56  ;;  %v4591_v44 = vadd.f32 %v803_v41, %v4537_v21  ;;  %v805_v46 = vpop.f32.mrb[10].mxu1  ;;  %v3947_v54 = vld [vmem:[#allocation2 + $0x1f8] ss:$12 sps:$4 sm:$0xff]  }
 0x150   : > { %v838_v20 = vpack.c.bf16 %v723_v11, %v719_v58  ;;  %1616 = vmatprep.subr.bf16.mxu0 %v3939_v60  ;;  %3470 = vmatprep.subr.bf16.mxu1 %v3950_v61  ;;  %v4595_v50 = vadd.f32 %v805_v46, %v4535_v19  ;;  %v807_v52 = vpop.f32.mrb[11].mxu1  ;;  %v3954_v58 = vld [vmem:[#allocation2 + $0x214] ss:$12 sps:$4 sm:$0xff]   ;;  %v3966_v12 = vld [vmem:[#allocation2 + $0x218] ss:$12 sps:$4 sm:$0xff]  }
 0x151   : > { %v839_v25 = vpack.c.bf16 %v725_v15, %v721_v1  ;;  %v4599_v56 = vadd.f32 %v807_v52, %v4537_v21 }
 0x152   : > { %v858_v27 = vmax.bf16 %v4249_v0, %v838_v20  ;;  %v840_v60 = vpack.c.bf16 %v4595_v50, %v4587_v39  ;;  %v3970_v20 = vld [vmem:[#allocation2 + $0x2f0] ss:$12 sps:$4 sm:$0xff]  }
 0x153   : > { %1617 = vmatpush1.bf16.msra.mxu0 %v3937_v16  ;;  %v728_v28 = vpop.f32.mrb[12].mxu0  ;;  %v859_v30 = vmax.bf16 %v4249_v0, %v839_v25  ;;  %3471 = vmatpush3.bf16.msra.mxu1 %v3951_v17  ;;  %v841_v63 = vpack.c.bf16 %v4599_v56, %v4591_v44  ;;  %v3959_v17 = vld [vmem:[#allocation2 + $0x22c] ss:$12 sps:$4 sm:$0xff]   ;;  %v3987_v56 = vld [vmem:[#allocation2 + $0x2e8] ss:$12 sps:$4 sm:$0xff]  }
 0x154   : > { %v729_v34 = vadd.f32 %v728_v28, %v4522_v6  ;;  %v730_v35 = vpop.f32.mrb[13].mxu0  ;;  %1618 = vmatprep.subr.bf16.mxu0 %v3944_v22  ;;  %3472 = vmatprep.subr.bf16.mxu1 %v3955_v23  ;;  %v860_v62 = vmax.bf16 %v4249_v0, %v840_v60  ;;  %v3989_v44 = vld [vmem:[#allocation2 + $0x2ec] ss:$12 sps:$4 sm:$0xff]   ;;  %v3990_v60 = vld [vmem:[%s5170_s5] ss:$8 sps:$4 sm:$0xff]  }
 0x155   : > { %v731_v42 = vadd.f32 %v730_v35, %v4525_v8  ;;  %v732_v43 = vpop.f32.mrb[14].mxu0  ;;  %1741 = vmatprep.mubr.bf16.mxu1 %v859_v30  ;;  %1579 = vmatprep.mubr.bf16.mxu0 %v859_v30  ;;  %v811_v14 = vpop.f32.mrb[12].mxu1 }
 0x156   : > { %v733_v47 = vadd.f32 %v732_v43, %v4522_v6  ;;  %v734_v48 = vpop.f32.mrb[15].mxu0  ;;  %1742 = vmatmul.mubr.bf16.gmra.mrb[28].mxu1 %v858_v27  ;;  %1580 = vmatmul.mubr.bf16.gmra.mrb[28].mxu0 %v858_v27  ;;  %v4609_v22 = vadd.f32 %v811_v14, %v4535_v19  ;;  %v813_v23 = vpop.f32.mrb[13].mxu1  ;;  %v3964_v43 = vld [vmem:[#allocation2 + $0x244] ss:$12 sps:$4 sm:$0xff]  }
 0x157   : > { %v735_v53 = vadd.f32 %v734_v48, %v4525_v8  ;;  %1619 = vmatpush1.bf16.msra.mxu0 %v3942_v29  ;;  %3473 = vmatpush3.bf16.msra.mxu1 %v3956_v31  ;;  %v4613_v28 = vadd.f32 %v813_v23, %v4537_v21  ;;  %v815_v29 = vpop.f32.mrb[14].mxu1  ;;  %v3962_v48 = vld [vmem:[#allocation2 + $0x240] ss:$12 sps:$4 sm:$0xff]   ;;  %v3972_v14 = vld [vmem:[#allocation2 + $0x270] ss:$12 sps:$4 sm:$0xff]  }
 0x158   : > { %v842_v57 = vpack.c.bf16 %v733_v47, %v729_v34  ;;  %1620 = vmatprep.subr.bf16.mxu0 %v3949_v37  ;;  %3474 = vmatprep.subr.bf16.mxu1 %v3960_v38  ;;  %v4617_v33 = vadd.f32 %v815_v29, %v4535_v19  ;;  %v817_v34 = vpop.f32.mrb[15].mxu1  ;;  %v3957_v37 = vld [vmem:[#allocation2 + $0x228] ss:$12 sps:$4 sm:$0xff]   ;;  %v3971_v38 = vld [vmem:[#allocation2 + $0x230] ss:$12 sps:$4 sm:$0xff]  }
 0x159   : > { %v843_v61 = vpack.c.bf16 %v735_v53, %v731_v42  ;;  %v4621_v41 = vadd.f32 %v817_v34, %v4537_v21  ;;  %v853_v53 = vmax.bf16 %v4249_v0, %v833_v51  ;;  %v3974_v51 = vld [vmem:[#allocation2 + $0x274] ss:$12 sps:$4 sm:$0xff]   ;;  %v3998_v23 = vld [vmem:[%s5170_s5 + $0x24] ss:$8 sps:$4 sm:$0xff]  }
 0x15a   : > { %v862_v1 = vmax.bf16 %v4249_v0, %v842_v57  ;;  %v4004_v29 = vld [vmem:[%s5170_s5 + $0x44] ss:$8 sps:$4 sm:$0xff]  }
 0x15b   : > { %1621 = vmatpush1.bf16.msra.mxu0 %v3947_v54  ;;  %v738_v4 = vpop.f32.mrb[16].mxu0  ;;  %v863_v11 = vmax.bf16 %v4249_v0, %v843_v61  ;;  %3475 = vmatpush3.bf16.msra.mxu1 %v3961_v55  ;;  %v845_v47 = vpack.c.bf16 %v4621_v41, %v4613_v28  ;;  %v3969_v55 = vld [vmem:[#allocation2 + $0x25c] ss:$12 sps:$4 sm:$0xff]   ;;  %v3999_v28 = vld [vmem:[%s5170_s5 + $0x30] ss:$8 sps:$4 sm:$0xff]  }
 0x15c   : > { %v739_v15 = vadd.f32 %v738_v4, %v4522_v6  ;;  %v740_v16 = vpop.f32.mrb[17].mxu0  ;;  %1622 = vmatprep.subr.bf16.mxu0 %v3954_v58  ;;  %3476 = vmatprep.subr.bf16.mxu1 %v3965_v59  ;;  %v4010_v34 = vld [vmem:[%s5170_s5 + $0x64] ss:$8 sps:$4 sm:$0xff]  }
 0x15d   : > { %v741_v25 = vadd.f32 %v740_v16, %v4525_v8  ;;  %v742_v27 = vpop.f32.mrb[18].mxu0  ;;  %1749 = vmatprep.mubr.bf16.mxu1 %v863_v11  ;;  %1589 = vmatprep.mubr.bf16.mxu0 %v863_v11  ;;  %v821_v54 = vpop.f32.mrb[16].mxu1  ;;  %v3980_v16 = vld [vmem:[#allocation2 + $0x2a4] ss:$12 sps:$4 sm:$0xff]   ;;  %v865_v24 = vmax.bf16 %v4249_v0, %v845_v47  ;;  %v4020_v47 = vld [vmem:[%s5170_s5 + $0xa0] ss:$8 sps:$4 sm:$0xff]  }
 0x15e   : > { %v743_v30 = vadd.f32 %v742_v27, %v4522_v6  ;;  %v744_v31 = vpop.f32.mrb[19].mxu0  ;;  %1750 = vmatmul.mubr.bf16.gmra.mrb[32].mxu1 %v862_v1  ;;  %1590 = vmatmul.mubr.bf16.gmra.mrb[32].mxu0 %v862_v1  ;;  %v844_v6 = vpack.c.bf16 %v4617_v33, %v4609_v22  ;;  %v822_v57 = vadd.f32 %v821_v54, %v4535_v19  ;;  %v823_v58 = vpop.f32.mrb[17].mxu1  ;;  %v3993_v22 = vld [vmem:[%s5170_s5 + $0x10] ss:$8 sps:$4 sm:$0xff]   ;;  %v4001_v27 = vld [vmem:[%s5170_s5 + $0x34] ss:$8 sps:$4 sm:$0xff]  }
 0x15f   : > { %v745_v35 = vadd.f32 %v744_v31, %v4525_v8  ;;  %1623 = vmatpush1.bf16.msra.mxu0 %v3952_v9  ;;  %3477 = vmatpush3.bf16.msra.mxu1 %v3966_v12  ;;  %v824_v59 = vadd.f32 %v823_v58, %v4537_v21  ;;  %v825_v61 = vpop.f32.mrb[18].mxu1  ;;  %v852_v12 = vmax.bf16 %v4249_v0, %v832_v49  ;;  %v4007_v31 = vld [vmem:[%s5170_s5 + $0x54] ss:$8 sps:$4 sm:$0xff]   ;;  %v4005_v33 = vld [vmem:[%s5170_s5 + $0x50] ss:$8 sps:$4 sm:$0xff]  }
 0x160   : > { %v846_v42 = vpack.c.bf16 %v743_v30, %v739_v15  ;;  %1624 = vmatprep.subr.bf16.mxu0 %v3959_v17  ;;  %3478 = vmatprep.subr.bf16.mxu1 %v3970_v20  ;;  %v826_v1 = vadd.f32 %v825_v61, %v4535_v19  ;;  %v827_v4 = vpop.f32.mrb[19].mxu1  ;;  %v857_v19 = vmax.bf16 %v4249_v0, %v837_v26  ;;  %v3977_v15 = vld [vmem:[#allocation2 + $0x28c] ss:$12 sps:$4 sm:$0xff]   ;;  %v3986_v26 = vld [vmem:[#allocation2 + $0x2d4] ss:$12 sps:$4 sm:$0xff]  }
 0x161   : > { %v847_v46 = vpack.c.bf16 %v745_v35, %v741_v25  ;;  %v828_v45 = vadd.f32 %v827_v4, %v4537_v21  ;;  %v3975_v21 = vld [vmem:[#allocation2 + $0x288] ss:$12 sps:$4 sm:$0xff]   ;;  %v861_v49 = vmax.bf16 %v4249_v0, %v841_v63  ;;  %v864_v63 = vmax.bf16 %v4249_v0, %v844_v6  ;;  %v3992_v17 = vld [vmem:[%s5170_s5 + $0x4] ss:$8 sps:$4 sm:$0xff]   ;;  %v4017_v6 = vld [vmem:[%s5170_s5 + $0x90] ss:$8 sps:$4 sm:$0xff]  }
 0x162   : > { %v866_v8 = vmax.bf16 %v4249_v0, %v846_v42  ;;  %v848_v9 = vpack.c.bf16 %v826_v1, %v822_v57  ;;  %v3995_v20 = vld [vmem:[%s5170_s5 + $0x14] ss:$8 sps:$4 sm:$0xff]   ;;  %v3996_v25 = vld [vmem:[%s5170_s5 + $0x20] ss:$8 sps:$4 sm:$0xff]   ;;  %v4016_v41 = vld [vmem:[%s5170_s5 + $0x84] ss:$8 sps:$4 sm:$0xff]  }
 0x163   : > { %1625 = vmatpush1.bf16.msra.mxu0 %v3957_v37  ;;  %v867_v52 = vmax.bf16 %v4249_v0, %v847_v46  ;;  %3479 = vmatpush3.bf16.msra.mxu1 %v3971_v38  ;;  %v849_v11 = vpack.c.bf16 %v828_v45, %v824_v59  ;;  %v4002_v30 = vld [vmem:[%s5170_s5 + $0x40] ss:$8 sps:$4 sm:$0xff]   ;;  %v4011_v37 = vld [vmem:[%s5170_s5 + $0x70] ss:$8 sps:$4 sm:$0xff]   ;;  %v4013_v38 = vld [vmem:[%s5170_s5 + $0x74] ss:$8 sps:$4 sm:$0xff]  }
 0x164   : > { %1626 = vmatprep.subr.bf16.mxu0 %v3964_v43  ;;  %v868_v50 = vmax.bf16 %v4249_v0, %v848_v9  ;;  %2169 = vmatprep.subr.bf16.mxu1 %v3992_v17  ;;  %v4008_v35 = vld [vmem:[%s5170_s5 + $0x60] ss:$8 sps:$4 sm:$0xff]   ;;  %v4019_v43 = vld [vmem:[%s5170_s5 + $0x94] ss:$8 sps:$4 sm:$0xff]   ;;  %v4022_v46 = vld [vmem:[%s5170_s5 + $0xa4] ss:$8 sps:$4 sm:$0xff]  }
 0x165   : > { %1757 = vmatprep.mubr.bf16.mxu1 %v867_v52  ;;  %1599 = vmatprep.mubr.bf16.mxu0 %v867_v52  ;;  %v869_v39 = vmax.bf16 %v4249_v0, %v849_v11  ;;  %v4014_v42 = vld [vmem:[%s5170_s5 + $0x80] ss:$8 sps:$4 sm:$0xff]   ;;  %v4028_v52 = vld [vmem:[%s5170_s5 + $0xc4] ss:$8 sps:$4 sm:$0xff]   ;;  %v4031_v54 = vld [vmem:[%s5170_s5 + $0xd4] ss:$8 sps:$4 sm:$0xff]  }
 0x166   : > { %1758 = vmatmul.mubr.bf16.gmra.mrb[36].mxu1 %v866_v8  ;;  %1600 = vmatmul.mubr.bf16.gmra.mrb[36].mxu0 %v866_v8  ;;  %v4025_v8 = vld [vmem:[%s5170_s5 + $0xb4] ss:$8 sps:$4 sm:$0xff]   ;;  %v4034_v57 = vld [vmem:[%s5170_s5 + $0xe4] ss:$8 sps:$4 sm:$0xff]   ;;  %v4032_v58 = vld [vmem:[%s5170_s5 + $0xe0] ss:$8 sps:$4 sm:$0xff]  }
 0x167   : > { %1627 = vmatpush1.bf16.msra.mxu0 %v3962_v48  ;;  %1798 = vmatprep.mubr.bf16.mxu1 %v853_v53  ;;  %v4023_v48 = vld [vmem:[%s5170_s5 + $0xb0] ss:$8 sps:$4 sm:$0xff]   ;;  %v4037_v59 = vld [vmem:[%s5170_s5 + $0xf4] ss:$8 sps:$4 sm:$0xff]   ;;  %v4040_v1 = vld [vmem:[%s5170_s5 + $0x104] ss:$8 sps:$4 sm:$0xff]  }
 0x168   : > { %1628 = vmatprep.subr.bf16.mxu0 %v3969_v55  ;;  %1642 = vmatprep.mubr.bf16.mxu0 %v853_v53  ;;  %v4026_v53 = vld [vmem:[%s5170_s5 + $0xc0] ss:$8 sps:$4 sm:$0xff]   ;;  %v4029_v55 = vld [vmem:[%s5170_s5 + $0xd0] ss:$8 sps:$4 sm:$0xff]  }
 0x169   : > { %v4035_v61 = vld [vmem:[%s5170_s5 + $0xf0] ss:$8 sps:$4 sm:$0xff]  }
 0x16a   : > { %v4067_v17 = vld [vmem:[%s5172_s7 + $0x10] sm:$0xff]  }
 0x16b   : > { %1629 = vmatpush1.bf16.msra.mxu0 %v3967_v36 }
 0x16c   : > { %1630 = vmatprep.subr.bf16.mxu0 %v3974_v51 }
 0x16e   : > { %1799 = vmatmul.mubr.bf16.vlgmr.msra.gmra.mrb[40].mxu1 %v852_v12 }
 0x16f   : > { %1631 = vmatpush1.bf16.msra.mxu0 %v3972_v14  ;;  %1806 = vmatprep.mubr.bf16.mxu1 %v857_v19 }
 0x170   : > { %1632 = vmatprep.subr.bf16.mxu0 %v3977_v15  ;;  %2170 = vmatpush1.bf16.msra.mxu1 %v3990_v60 }
 0x171   : > { %2171 = vmatprep.subr.bf16.mxu1 %v3995_v20 }
 0x173   : > { %1633 = vmatpush1.bf16.msra.mxu0 %v3975_v21 }
 0x174   : > { %1634 = vmatprep.subr.bf16.mxu0 %v3980_v16  ;;  %2172 = vmatpush1.bf16.msra.mxu1 %v3993_v22  ;;  %v4068_v22 = vld [vmem:[%s5172_s7 + $0x58] sm:$0xff]  }
 0x175   : > { %2173 = vmatprep.subr.bf16.mxu1 %v3998_v23 }
 0x176   : > { %1807 = vmatmul.mubr.bf16.gmra.mrb[44].mxu1 %v856_v32 }
 0x177   : > { %1635 = vmatpush1.bf16.msra.mxu0 %v3978_v40  ;;  %1814 = vmatprep.mubr.bf16.mxu1 %v861_v49 }
 0x178   : > { %1636 = vmatprep.subr.bf16.mxu0 %v3983_v7  ;;  %2174 = vmatpush1.bf16.msra.mxu1 %v3996_v25  ;;  %v4069_v25 = vld [vmem:[%s5172_s7 + $0x18] sm:$0xff]  }
 0x179   : > { %2175 = vmatprep.subr.bf16.mxu1 %v4001_v27  ;;  %v4070_v27 = vld [vmem:[%s5172_s7 + $0x60] sm:$0xff]  }
 0x17b   : > { %1637 = vmatpush1.bf16.msra.mxu0 %v3981_v18 }
 0x17c   : > { %1638 = vmatprep.subr.bf16.mxu0 %v3986_v26  ;;  %2176 = vmatpush1.bf16.msra.mxu1 %v3999_v28  ;;  %v4062_v26 = vld [vmem:[%s5172_s7 + $0x40] sm:$0xff]  }
 0x17d   : > { %2177 = vmatprep.subr.bf16.mxu1 %v4004_v29 }
 0x17e   : > { %1815 = vmatmul.mubr.bf16.gmra.mrb[48].mxu1 %v860_v62 }
 0x17f   : > { %1639 = vmatpush1.bf16.msra.mxu0 %v3984_v13  ;;  %1822 = vmatprep.mubr.bf16.mxu1 %v865_v24  ;;  %v4064_v13 = vld [vmem:[%s5172_s7 + $0x48] sm:$0xff]  }
 0x180   : > { %1640 = vmatprep.subr.bf16.mxu0 %v3989_v44  ;;  %2178 = vmatpush1.bf16.msra.mxu1 %v4002_v30  ;;  %v4065_v44 = vld [vmem:[%s5172_s7 + $0x8] sm:$0xff]  }
 0x181   : > { %2179 = vmatprep.subr.bf16.mxu1 %v4007_v31 }
 0x183   : > { %1641 = vmatpush1.bf16.msra.mxu0 %v3987_v56  ;;  %v4066_v56 = vld [vmem:[%s5172_s7 + $0x50] sm:$0xff]  }
 0x184   : > { %2180 = vmatpush1.bf16.msra.mxu1 %v4005_v33  ;;  %3510 = vmatprep.subr.bf16.mxu0 %v4062_v26  ;;  %v4071_v33 = vld [vmem:[%s5172_s7 + $0x20] sm:$0xff]  }
 0x185   : > { %2181 = vmatprep.subr.bf16.mxu1 %v4010_v34  ;;  %v998_v34 = vld [vmem:[%s5169_s4] sm:$0x7] }
 0x186   : > { %1643 = vmatmul.mubr.bf16.vlgmr.msra.gmra.mrb[20].mxu0 %v852_v12  ;;  %1823 = vmatmul.mubr.bf16.gmra.mrb[52].mxu1 %v864_v63 }
 0x187   : > { %1652 = vmatprep.mubr.bf16.mxu0 %v857_v19  ;;  %1830 = vmatprep.mubr.bf16.mxu1 %v869_v39 }
 0x188   : > { %2182 = vmatpush1.bf16.msra.mxu1 %v4008_v35 }
 0x189   : > { %2183 = vmatprep.subr.bf16.mxu1 %v4013_v38 }
 0x18c   : > { %2184 = vmatpush1.bf16.msra.mxu1 %v4011_v37  ;;  %v4072_v37 = vld [vmem:[%s5172_s7 + $0x68] sm:$0xff]  }
 0x18d   : > { %2185 = vmatprep.subr.bf16.mxu1 %v4016_v41  ;;  %v4813_v41 = vrot.slane %v998_v34, %v573_v10 }
 0x18e   : > { %1653 = vmatmul.mubr.bf16.gmra.mrb[24].mxu0 %v856_v32  ;;  %1831 = vmatmul.mubr.bf16.gmra.mrb[56].mxu1 %v868_v50 }
 0x18f   : > { %1662 = vmatprep.mubr.bf16.mxu0 %v861_v49 }
 0x190   : > { %2186 = vmatpush1.bf16.msra.mxu1 %v4014_v42  ;;  %v4073_v42 = vld [vmem:[%s5172_s7 + $0x28] sm:$0xff]  }
 0x191   : > { %2187 = vmatprep.subr.bf16.mxu1 %v4019_v43 }
 0x194   : > { %2188 = vmatpush1.bf16.msra.mxu1 %v4017_v6 }
 0x195   : > { %2189 = vmatprep.subr.bf16.mxu1 %v4022_v46 }
 0x196   : > { %1663 = vmatmul.mubr.bf16.gmra.mrb[28].mxu0 %v860_v62  ;;  %v4063_v62 = vld [vmem:[%s5172_s7] sm:$0xff]  }
 0x197   : > { %1672 = vmatprep.mubr.bf16.mxu0 %v865_v24  ;;  %3511 = vmatpush3.bf16.msra.mxu0 %v4063_v62 }
 0x198   : > { %2190 = vmatpush1.bf16.msra.mxu1 %v4020_v47  ;;  %3512 = vmatprep.subr.bf16.mxu0 %v4064_v13 }
 0x199   : > { %2191 = vmatprep.subr.bf16.mxu1 %v4025_v8 }
 0x19b   : > { %3513 = vmatpush3.bf16.msra.mxu0 %v4065_v44 }
 0x19c   : > { %2192 = vmatpush1.bf16.msra.mxu1 %v4023_v48  ;;  %3514 = vmatprep.subr.bf16.mxu0 %v4066_v56 }
 0x19d   : > { %2193 = vmatprep.subr.bf16.mxu1 %v4028_v52 }
 0x19e   : > { %1673 = vmatmul.mubr.bf16.gmra.mrb[32].mxu0 %v864_v63 }
 0x19f   : > { %1682 = vmatprep.mubr.bf16.mxu0 %v869_v39  ;;  %3515 = vmatpush3.bf16.msra.mxu0 %v4067_v17 }
 0x1a0   : > { %2194 = vmatpush1.bf16.msra.mxu1 %v4026_v53  ;;  %3516 = vmatprep.subr.bf16.mxu0 %v4068_v22 }
 0x1a1   : > { %2195 = vmatprep.subr.bf16.mxu1 %v4031_v54 }
 0x1a3   : > { %3517 = vmatpush3.bf16.msra.mxu0 %v4069_v25 }
 0x1a4   : > { %2196 = vmatpush1.bf16.msra.mxu1 %v4029_v55  ;;  %3518 = vmatprep.subr.bf16.mxu0 %v4070_v27 }
 0x1a5   : > { %2197 = vmatprep.subr.bf16.mxu1 %v4034_v57 }
 0x1a6   : > { %1683 = vmatmul.mubr.bf16.gmra.mrb[36].mxu0 %v868_v50 }
 0x1a7   : > { %3519 = vmatpush3.bf16.msra.mxu0 %v4071_v33 }
 0x1a8   : > { %2198 = vmatpush1.bf16.msra.mxu1 %v4032_v58  ;;  %3520 = vmatprep.subr.bf16.mxu0 %v4072_v37 }
 0x1a9   : > { %2199 = vmatprep.subr.bf16.mxu1 %v4037_v59 }
 0x1ab   : > { %3521 = vmatpush3.bf16.msra.mxu0 %v4073_v42 }
 0x1ac   : > { %2200 = vmatpush1.bf16.msra.mxu1 %v4035_v61 }
 0x1ad   : > { %2252 = vmatprep.subr.bf16.mxu1 %v4040_v1 }
 0x219   : > { %v3434_v4 = vpop.f32.mrb[20].mxu1 }
 0x21a   : > { %v3435_v36 = vpop.f32.mrb[21].mxu1 }
 0x21b   : > { %v3436_v45 = vadd.f32 %v3435_v36, %v3434_v4  ;;  %v3437_v51 = vpop.f32.mrb[22].mxu1 }
 0x21c   : > { %v3438_v9 = vpop.f32.mrb[23].mxu1 }
 0x21d   : > { %v3439_v11 = vadd.f32 %v3438_v9, %v3437_v51  ;;  %v1728_v46 = vadd.f32 %v3436_v45, %v4813_v41 }
 0x21f   : > { %v1731_v52 = vadd.f32 %v3439_v11, %v4813_v41 }
 0x221   : > { %v3440_v12 = vpop.f32.mrb[24].mxu1 }
 0x222   : > { %v3441_v14 = vpop.f32.mrb[25].mxu1 }
 0x223   : > { %v3442_v19 = vadd.f32 %v3441_v14, %v3440_v12  ;;  %v3443_v15 = vpop.f32.mrb[26].mxu1 }
 0x224   : > { %v3444_v21 = vpop.f32.mrb[27].mxu1 }
 0x225   : > { %v3445_v16 = vadd.f32 %v3444_v21, %v3443_v15  ;;  %v1736_v58 = vadd.f32 %v3442_v19, %v4813_v41 }
 0x227   : > { %v1739_v4 = vadd.f32 %v3445_v16, %v4813_v41 }
 0x229   : > { %v3446_v32 = vpop.f32.mrb[28].mxu1 }
 0x22a   : > { %v3447_v40 = vpop.f32.mrb[29].mxu1 }
 0x22b   : > { %v4763_v49 = vadd.f32 %v3447_v40, %v3446_v32  ;;  %v3449_v7 = vpop.f32.mrb[30].mxu1 }
 0x22c   : > { %v3450_v18 = vpop.f32.mrb[31].mxu1 }
 0x22d   : > { %v4774_v24 = vadd.f32 %v3450_v18, %v3449_v7  ;;  %v1744_v14 = vadd.f32 %v4763_v49, %v4813_v41  ;;  %v4843_v18 = vrot.slane %v998_v34, %v4513_v3  ;;  %v4848_v49 = vrot.slane %v998_v34, %v4519_v5 }
 0x22f   : > { %v1747_v32 = vadd.f32 %v4774_v24, %v4813_v41 }
 0x231   : > { %v3452_v63 = vpop.f32.mrb[32].mxu1 }
 0x232   : > { %v3453_v39 = vpop.f32.mrb[33].mxu1 }
 0x233   : > { %v4782_v50 = vadd.f32 %v3453_v39, %v3452_v63  ;;  %v3455_v60 = vpop.f32.mrb[34].mxu1 }
 0x234   : > { %v3456_v20 = vpop.f32.mrb[35].mxu1 }
 0x235   : > { %v4790_v23 = vadd.f32 %v3456_v20, %v3455_v60  ;;  %v1752_v24 = vadd.f32 %v4782_v50, %v4813_v41 }
 0x237   : > { %v1755_v17 = vadd.f32 %v4790_v23, %v4813_v41 }
 0x239   : > { %v3458_v28 = vpop.f32.mrb[36].mxu1 }
 0x23a   : > { %v3459_v29 = vpop.f32.mrb[37].mxu1 }
 0x23b   : > { %v4798_v30 = vadd.f32 %v3459_v29, %v3458_v28  ;;  %v3461_v31 = vpop.f32.mrb[38].mxu1 }
 0x23c   : > { %v3462_v35 = vpop.f32.mrb[39].mxu1 }
 0x23d   : > { %v4809_v38 = vadd.f32 %v3462_v35, %v3461_v31 }
 0x241   : > { %v3480_v43 = vpop.f32.mrb[40].mxu1 }
 0x242   : > { %v3481_v6 = vpop.f32.mrb[41].mxu1 }
 0x243   : > { %v3482_v47 = vadd.f32 %v3481_v6, %v3480_v43  ;;  %v3483_v8 = vpop.f32.mrb[42].mxu1  ;;  %v4038_v6 = vld [vmem:[%s5170_s5 + $0x100] ss:$8 sps:$4 sm:$0xff]  }
 0x244   : > { %v3484_v48 = vpop.f32.mrb[43].mxu1 }
 0x245   : > { %v4820_v53 = vadd.f32 %v3482_v47, %v1728_v46  ;;  %v3485_v2 = vadd.f32 %v3484_v48, %v3483_v8  ;;  %v4043_v48 = vld [vmem:[%s5170_s5 + $0x114] ss:$8 sps:$4 sm:$0xff]  }
 0x247   : > { %v4822_v10 = vadd.f32 %v3485_v2, %v1731_v52  ;;  %v1760_v52 = vadd.f32 %v4798_v30, %v4813_v41 }
 0x249   : > { %v1841_v54 = vpack.c.bf16 %v4822_v10, %v4820_v53  ;;  %v3486_v55 = vpop.f32.mrb[44].mxu1 }
 0x24a   : > { %v3487_v57 = vpop.f32.mrb[45].mxu1 }
 0x24b   : > { %v3488_v59 = vadd.f32 %v3487_v57, %v3486_v55  ;;  %v3489_v61 = vpop.f32.mrb[46].mxu1 }
 0x24c   : > { %v3490_v1 = vpop.f32.mrb[47].mxu1 }
 0x24d   : > { %v4828_v36 = vadd.f32 %v3488_v59, %v1736_v58  ;;  %v3491_v45 = vadd.f32 %v3490_v1, %v3489_v61  ;;  %v1763_v58 = vadd.f32 %v4809_v38, %v4813_v41  ;;  %v4046_v41 = vld [vmem:[%s5170_s5 + $0x124] ss:$8 sps:$4 sm:$0xff]  }
 0x24f   : > { %v4830_v51 = vadd.f32 %v3491_v45, %v1739_v4 }
 0x251   : > { %v1844_v9 = vpack.c.bf16 %v4830_v51, %v4828_v36  ;;  %v3492_v11 = vpop.f32.mrb[48].mxu1  ;;  %v4075_v36 = vld [vmem:[%s5172_s7 + $0x30] sm:$0xff]   ;;  %v4076_v51 = vld [vmem:[%s5172_s7 + $0x78] sm:$0xff]  }
 0x252   : > { %v3493_v12 = vpop.f32.mrb[49].mxu1 }
 0x253   : > { %v3494_v15 = vadd.f32 %v3493_v12, %v3492_v11  ;;  %v3495_v19 = vpop.f32.mrb[50].mxu1 }
 0x254   : > { %v3496_v21 = vpop.f32.mrb[51].mxu1 }
 0x255   : > { %v4838_v16 = vadd.f32 %v3494_v15, %v1744_v14  ;;  %v3497_v40 = vadd.f32 %v3496_v21, %v3495_v19  ;;  %v4041_v14 = vld [vmem:[%s5170_s5 + $0x110] ss:$8 sps:$4 sm:$0xff]  }
 0x257   : > { %v4840_v7 = vadd.f32 %v3497_v40, %v1747_v32 }
 0x259   : > { %v1847_v26 = vpack.c.bf16 %v4840_v7, %v4838_v16  ;;  %v1644_v62 = vpop.f32.mrb[20].mxu0  ;;  %v3498_v13 = vpop.f32.mrb[52].mxu1  ;;  %v4250_v16 = vmov 0.0   ;;  %v1917_v7 = vld [vmem:[%s5171_s6] sm:$0x3] }
 0x25a   : > { %v1646_v44 = vpop.f32.mrb[21].mxu0  ;;  %v3499_v56 = vpop.f32.mrb[53].mxu1  ;;  %v3719_v20 = vadd.f32 %v1644_v62, %v4843_v18  ;;  %v4044_v62 = vld [vmem:[%s5170_s5 + $0x120] ss:$8 sps:$4 sm:$0xff]  }
 0x25b   : > { %v1648_v63 = vpop.f32.mrb[22].mxu0  ;;  %v3500_v39 = vadd.f32 %v3499_v56, %v3498_v13  ;;  %v3501_v60 = vpop.f32.mrb[54].mxu1  ;;  %v3720_v28 = vadd.f32 %v1646_v44, %v4848_v49  ;;  %v4049_v56 = vld [vmem:[%s5170_s5 + $0x134] ss:$8 sps:$4 sm:$0xff]  }
 0x25c   : > { %v3721_v22 = vadd.f32 %v1648_v63, %v4843_v18  ;;  %v1650_v25 = vpop.f32.mrb[23].mxu0  ;;  %v3502_v27 = vpop.f32.mrb[55].mxu1 }
 0x25d   : > { %v4857_v29 = vadd.f32 %v3500_v39, %v1752_v24  ;;  %v3722_v31 = vadd.f32 %v1650_v25, %v4848_v49  ;;  %v3503_v33 = vadd.f32 %v3502_v27, %v3501_v60  ;;  %v4052_v27 = vld [vmem:[%s5170_s5 + $0x144] ss:$8 sps:$4 sm:$0xff]  }
 0x25e   : > { %v1839_v50 = vpack.c.bf16 %v3721_v22, %v3719_v20  ;;  %v4047_v22 = vld [vmem:[%s5170_s5 + $0x130] ss:$8 sps:$4 sm:$0xff]  }
 0x25f   : > { %v1840_v34 = vpack.c.bf16 %v3722_v31, %v3720_v28  ;;  %v4860_v35 = vadd.f32 %v3503_v33, %v1755_v17 }
 0x260   : > { %v1854_v46 = vmax.bf16 %v4249_v0, %v1839_v50  ;;  %v4050_v50 = vld [vmem:[%s5170_s5 + $0x140] ss:$8 sps:$4 sm:$0xff]  }
 0x261   : > { %v1850_v23 = vpack.c.bf16 %v4860_v35, %v4857_v29  ;;  %v1654_v37 = vpop.f32.mrb[24].mxu0  ;;  %v3504_v42 = vpop.f32.mrb[56].mxu1  ;;  %v1855_v43 = vmax.bf16 %v4249_v0, %v1840_v34  ;;  %v4991_v35 = vrot.slane %v1917_v7, %v4519_v5  ;;  %v4078_v5 = vld [vmem:[%s5174_s9] sm:$0xff]  }
 0x262   : > { %v1656_v47 = vpop.f32.mrb[25].mxu0  ;;  %v3505_v8 = vpop.f32.mrb[57].mxu1  ;;  %v3723_v59 = vadd.f32 %v1654_v37, %v4843_v18 }
 0x263   : > { %v1658_v2 = vpop.f32.mrb[26].mxu0  ;;  %v3506_v55 = vadd.f32 %v3505_v8, %v3504_v42  ;;  %2201 = vmatprep.mubr.bf16.mxu1 %v1855_v43  ;;  %v3507_v57 = vpop.f32.mrb[58].mxu1  ;;  %v3724_v45 = vadd.f32 %v1656_v47, %v4848_v49  ;;  %v4055_v42 = vld [vmem:[%s5170_s5 + $0x154] ss:$8 sps:$4 sm:$0xff]   ;;  %v1865_v53 = vmax.bf16 %v4249_v0, %v1850_v23 }
 0x264   : > { %v3725_v61 = vadd.f32 %v1658_v2, %v4843_v18  ;;  %v1660_v1 = vpop.f32.mrb[27].mxu0  ;;  %2202 = vmatmul.mubr.bf16.vlgmr.msra.gmra.mrb[60].mxu1 %v1854_v46  ;;  %v3508_v4 = vpop.f32.mrb[59].mxu1 }
 0x265   : > { %v4879_v11 = vadd.f32 %v3506_v55, %v1760_v52  ;;  %v3726_v30 = vadd.f32 %v1660_v1, %v4848_v49  ;;  %2253 = vmatpush1.bf16.msra.mxu1 %v4038_v6  ;;  %v3509_v12 = vadd.f32 %v3508_v4, %v3507_v57  ;;  %v4053_v52 = vld [vmem:[%s5170_s5 + $0x150] ss:$8 sps:$4 sm:$0xff]   ;;  %v4058_v55 = vld [vmem:[%s5170_s5 + $0x164] ss:$8 sps:$4 sm:$0xff]  }
 0x266   : > { %v1842_v38 = vpack.c.bf16 %v3725_v61, %v3723_v59  ;;  %2254 = vmatprep.subr.bf16.mxu1 %v4043_v48  ;;  %v4056_v61 = vld [vmem:[%s5170_s5 + $0x160] ss:$8 sps:$4 sm:$0xff]  }
 0x267   : > { %v1843_v15 = vpack.c.bf16 %v3726_v30, %v3724_v45  ;;  %v4888_v19 = vadd.f32 %v3509_v12, %v1763_v58  ;;  %v4061_v45 = vld [vmem:[%s5170_s5 + $0x174] ss:$8 sps:$4 sm:$0xff]  }
 0x268   : > { %v1857_v44 = vmax.bf16 %v4249_v0, %v1842_v38 }
 0x269   : > { %v1853_v21 = vpack.c.bf16 %v4888_v19, %v4879_v11  ;;  %v1664_v32 = vpop.f32.mrb[28].mxu0  ;;  %2255 = vmatpush1.bf16.msra.mxu1 %v4041_v14  ;;  %v1858_v40 = vmax.bf16 %v4249_v0, %v1843_v15 }
 0x26a   : > { %v1666_v13 = vpop.f32.mrb[29].mxu0  ;;  %2256 = vmatprep.subr.bf16.mxu1 %v4046_v41  ;;  %v3727_v63 = vadd.f32 %v1664_v32, %v4843_v18  ;;  %v4059_v32 = vld [vmem:[%s5170_s5 + $0x170] ss:$8 sps:$4 sm:$0xff]  }
 0x26b   : > { %v1668_v24 = vpop.f32.mrb[30].mxu0  ;;  %2211 = vmatprep.mubr.bf16.mxu1 %v1858_v40  ;;  %v3728_v17 = vadd.f32 %v1666_v13, %v4848_v49  ;;  %v1868_v10 = vmax.bf16 %v4249_v0, %v1853_v21 }
 0x26c   : > { %v3729_v39 = vadd.f32 %v1668_v24, %v4843_v18  ;;  %v1670_v60 = vpop.f32.mrb[31].mxu0  ;;  %2212 = vmatmul.mubr.bf16.gmra.mrb[64].mxu1 %v1857_v44 }
 0x26d   : > { %v3730_v20 = vadd.f32 %v1670_v60, %v4848_v49  ;;  %2257 = vmatpush1.bf16.msra.mxu1 %v4044_v62 }
 0x26e   : > { %v1845_v25 = vpack.c.bf16 %v3729_v39, %v3727_v63  ;;  %2258 = vmatprep.subr.bf16.mxu1 %v4049_v56  ;;  %v1862_v56 = vmax.bf16 %v4249_v0, %v1847_v26  ;;  %v4988_v26 = vrot.slane %v1917_v7, %v4513_v3 }
 0x26f   : > { %v1846_v28 = vpack.c.bf16 %v3730_v20, %v3728_v17 }
 0x270   : > { %v1860_v37 = vmax.bf16 %v4249_v0, %v1845_v25 }
 0x271   : > { %v1674_v31 = vpop.f32.mrb[32].mxu0  ;;  %v1861_v33 = vmax.bf16 %v4249_v0, %v1846_v28  ;;  %2259 = vmatpush1.bf16.msra.mxu1 %v4047_v22 }
 0x272   : > { %v1676_v34 = vpop.f32.mrb[33].mxu0  ;;  %2260 = vmatprep.subr.bf16.mxu1 %v4052_v27  ;;  %v3731_v6 = vadd.f32 %v1674_v31, %v4843_v18 }
 0x273   : > { %v1678_v43 = vpop.f32.mrb[34].mxu0  ;;  %2221 = vmatprep.mubr.bf16.mxu1 %v1861_v33  ;;  %v3732_v8 = vadd.f32 %v1676_v34, %v4848_v49 }
 0x274   : > { %v3733_v46 = vadd.f32 %v1678_v43, %v4843_v18  ;;  %v1680_v47 = vpop.f32.mrb[35].mxu0  ;;  %2222 = vmatmul.mubr.bf16.gmra.mrb[68].mxu1 %v1860_v37  ;;  %v4079_v37 = vld [vmem:[%s5174_s9 + $0x8] sm:$0xff]  }
 0x275   : > { %v3734_v48 = vadd.f32 %v1680_v47, %v4848_v49  ;;  %2261 = vmatpush1.bf16.msra.mxu1 %v4050_v50  ;;  %v4080_v47 = vld [vmem:[%s5174_s9 + $0x10] sm:$0xff]  }
 0x276   : > { %v1848_v2 = vpack.c.bf16 %v3733_v46, %v3731_v6  ;;  %2262 = vmatprep.subr.bf16.mxu1 %v4055_v42 }
 0x277   : > { %v1849_v57 = vpack.c.bf16 %v3734_v48, %v3732_v8 }
 0x278   : > { %v1863_v4 = vmax.bf16 %v4249_v0, %v1848_v2 }
 0x279   : > { %v1684_v58 = vpop.f32.mrb[36].mxu0  ;;  %v1864_v59 = vmax.bf16 %v4249_v0, %v1849_v57  ;;  %2263 = vmatpush1.bf16.msra.mxu1 %v4053_v52 }
 0x27a   : > { %v1686_v1 = vpop.f32.mrb[37].mxu0  ;;  %2264 = vmatprep.subr.bf16.mxu1 %v4058_v55  ;;  %v3735_v12 = vadd.f32 %v1684_v58, %v4843_v18 }
 0x27b   : > { %v1688_v30 = vpop.f32.mrb[38].mxu0  ;;  %2231 = vmatprep.mubr.bf16.mxu1 %v1864_v59  ;;  %v3736_v41 = vadd.f32 %v1686_v1, %v4848_v49 }
 0x27c   : > { %v3737_v14 = vadd.f32 %v1688_v30, %v4843_v18  ;;  %v1690_v38 = vpop.f32.mrb[39].mxu0  ;;  %2232 = vmatmul.mubr.bf16.gmra.mrb[72].mxu1 %v1863_v4  ;;  %v1856_v18 = vmax.bf16 %v4249_v0, %v1841_v54  ;;  %v4074_v54 = vld [vmem:[%s5172_s7 + $0x70] sm:$0xff]  }
 0x27d   : > { %v3738_v15 = vadd.f32 %v1690_v38, %v4848_v49  ;;  %2265 = vmatpush1.bf16.msra.mxu1 %v4056_v61  ;;  %v1859_v49 = vmax.bf16 %v4249_v0, %v1844_v9  ;;  %3522 = vmatprep.subr.bf16.mxu0 %v4074_v54  ;;  %v4077_v9 = vld [vmem:[%s5172_s7 + $0x38] sm:$0xff]  }
 0x27e   : > { %v1851_v40 = vpack.c.bf16 %v3737_v14, %v3735_v12  ;;  %2266 = vmatprep.subr.bf16.mxu1 %v4061_v45  ;;  %3523 = vmatpush3.bf16.msra.mxu0 %v4075_v36  ;;  %v4081_v61 = vld [vmem:[%s5174_s9 + $0x18] sm:$0xff]   ;;  %v4082_v12 = vld [vmem:[%s5174_s9 + $0x20] sm:$0xff]  }
 0x27f   : > { %v1852_v62 = vpack.c.bf16 %v3738_v15, %v3736_v41  ;;  %3524 = vmatprep.subr.bf16.mxu0 %v4076_v51 }
 0x280   : > { %v1866_v44 = vmax.bf16 %v4249_v0, %v1851_v40 }
 0x281   : > { %v1867_v13 = vmax.bf16 %v4249_v0, %v1852_v62  ;;  %2267 = vmatpush1.bf16.msra.mxu1 %v4059_v32 }
 0x282   : > { %3525 = vmatpush3.bf16.msra.mxu0 %v4077_v9  ;;  %3631 = vmatprep.subr.bf16.mxu1 %v4250_v16 }
 0x283   : > { %2241 = vmatprep.mubr.bf16.mxu1 %v1867_v13  ;;  %3595 = vmatprep.subr.bf16.mxu0 %v4250_v16 }
 0x284   : > { %2242 = vmatmul.mubr.bf16.gmra.mrb[76].mxu1 %v1866_v44  ;;  %v4083_v44 = vld [vmem:[%s5174_s9 + $0x28] sm:$0xff]  }
 0x285   : > { %2284 = vmatprep.mubr.bf16.mxu1 %v4249_v0 }
 0x28c   : > { %2285 = vmatmul.mubr.bf16.vlgmr.msra.gmra.mrb[60].mxu1 %v1856_v18 }
 0x28d   : > { %2294 = vmatprep.mubr.bf16.mxu1 %v4249_v0 }
 0x294   : > { %2295 = vmatmul.mubr.bf16.gmra.mrb[64].mxu1 %v1859_v49 }
 0x295   : > { %2304 = vmatprep.mubr.bf16.mxu1 %v4249_v0 }
 0x29c   : > { %2305 = vmatmul.mubr.bf16.gmra.mrb[68].mxu1 %v1862_v56 }
 0x29d   : > { %2314 = vmatprep.mubr.bf16.mxu1 %v4249_v0 }
 0x2a4   : > { %2315 = vmatmul.mubr.bf16.gmra.mrb[72].mxu1 %v1865_v53 }
 0x2a5   : > { %2324 = vmatprep.mubr.bf16.mxu1 %v4249_v0 }
 0x2ac   : > { %2325 = vmatmul.mubr.bf16.gmra.mrb[76].mxu1 %v1868_v10 }
 0x2ad   : > { %3647 = vmatprep.mubr.msk.bf16.mxu1 %vm4251_vm1, %v4250_v16 }
 0x35f   : > { %v2286_v29 = vpop.f32.mrb[60].mxu1 }
 0x360   : > { %v2288_v23 = vpop.f32.mrb[61].mxu1  ;;  %v3739_v19 = vadd.f32 %v2286_v29, %v4988_v26 }
 0x361   : > { %v2290_v11 = vpop.f32.mrb[62].mxu1  ;;  %v3740_v63 = vadd.f32 %v2288_v23, %v4991_v35 }
 0x362   : > { %v3741_v21 = vadd.f32 %v2290_v11, %v4988_v26  ;;  %v2292_v24 = vpop.f32.mrb[63].mxu1 }
 0x363   : > { %v3742_v39 = vadd.f32 %v2292_v24, %v4991_v35 }
 0x364   : > { %v2335_v60 = vpack.c.bf16 %v3741_v21, %v3739_v19 }
 0x365   : > { %v2336_v17 = vpack.c.bf16 %v3742_v39, %v3740_v63  ;;  %v4084_v63 = vld [vmem:[%s5174_s9 + $0x30] sm:$0xff]   ;;  %v4087_v39 = vld [vmem:[#allocation4 + $0x8] sm:$0xff]  }
 0x366   : > { %v2345_v22 = vmax.bf16 %v4249_v0, %v2335_v60  ;;  %v4088_v60 = vld [vmem:[#allocation4 + $0x10] sm:$0xff]  }
 0x367   : > { %v2296_v20 = vpop.f32.mrb[64].mxu1  ;;  %v2346_v3 = vmax.bf16 %v4249_v0, %v2336_v17  ;;  %v4089_v17 = vld [vmem:[#allocation4 + $0x18] sm:$0xff]  }
 0x368   : > { %v2298_v25 = vpop.f32.mrb[65].mxu1  ;;  %v3743_v28 = vadd.f32 %v2296_v20, %v4988_v26  ;;  %v4090_v20 = vld [vmem:[#allocation4 + $0x20] sm:$0xff]  }
 0x369   : > { %v2300_v27 = vpop.f32.mrb[66].mxu1  ;;  %2522 = vmatprep.mubr.bf16.mxu0 %v2346_v3  ;;  %v3744_v50 = vadd.f32 %v2298_v25, %v4991_v35  ;;  %v4091_v3 = vld [vmem:[#allocation4 + $0x28] sm:$0xff]  }
 0x36a   : > { %v3745_v31 = vadd.f32 %v2300_v27, %v4988_v26  ;;  %v2302_v33 = vpop.f32.mrb[67].mxu1  ;;  %2523 = vmatmul.mubr.bf16.vlgmr.msra.gmra.mrb[40].mxu0 %v2345_v22 }
 0x36b   : > { %v3746_v34 = vadd.f32 %v2302_v33, %v4991_v35  ;;  %3596 = vmatpush3.bf16.msra.mxu0 %v4078_v5  ;;  %v4092_v5 = vld [vmem:[#allocation4 + $0x30] sm:$0xff]  }
 0x36c   : > { %v2337_v42 = vpack.c.bf16 %v3745_v31, %v3743_v28  ;;  %3597 = vmatprep.subr.bf16.mxu0 %v4250_v16  ;;  %v3362_v31 = vld [vmem:[%s5173_s8] ss:$0 sm:$0xff] }
 0x36d   : > { %v2338_v43 = vpack.c.bf16 %v3746_v34, %v3744_v50 }
 0x36e   : > { %v2347_v48 = vmax.bf16 %v4249_v0, %v2337_v42 }
 0x36f   : > { %v2306_v6 = vpop.f32.mrb[68].mxu1  ;;  %v2348_v46 = vmax.bf16 %v4249_v0, %v2338_v43  ;;  %3598 = vmatpush3.bf16.msra.mxu0 %v4079_v37 }
 0x370   : > { %v2308_v8 = vpop.f32.mrb[69].mxu1  ;;  %3599 = vmatprep.subr.bf16.mxu0 %v4250_v16  ;;  %v3747_v2 = vadd.f32 %v2306_v6, %v4988_v26 }
 0x371   : > { %v2310_v52 = vpop.f32.mrb[70].mxu1  ;;  %2530 = vmatprep.mubr.bf16.mxu0 %v2348_v46  ;;  %v3748_v58 = vadd.f32 %v2308_v8, %v4991_v35 }
 0x372   : > { %v3749_v55 = vadd.f32 %v2310_v52, %v4988_v26  ;;  %v2312_v57 = vpop.f32.mrb[71].mxu1  ;;  %2531 = vmatmul.mubr.bf16.gmra.mrb[44].mxu0 %v2347_v48 }
 0x373   : > { %v3750_v59 = vadd.f32 %v2312_v57, %v4991_v35  ;;  %3600 = vmatpush3.bf16.msra.mxu0 %v4080_v47 }
 0x374   : > { %v2339_v1 = vpack.c.bf16 %v3749_v55, %v3747_v2  ;;  %3601 = vmatprep.subr.bf16.mxu0 %v4250_v16 }
 0x375   : > { %v2340_v4 = vpack.c.bf16 %v3750_v59, %v3748_v58 }
 0x376   : > { %v2349_v38 = vmax.bf16 %v4249_v0, %v2339_v1 }
 0x377   : > { %v2316_v45 = vpop.f32.mrb[72].mxu1  ;;  %v2350_v30 = vmax.bf16 %v4249_v0, %v2340_v4  ;;  %3602 = vmatpush3.bf16.msra.mxu0 %v4081_v61 }
 0x378   : > { %v2318_v14 = vpop.f32.mrb[73].mxu1  ;;  %3603 = vmatprep.subr.bf16.mxu0 %v4250_v16  ;;  %v3751_v15 = vadd.f32 %v2316_v45, %v4988_v26 }
 0x379   : > { %v2320_v41 = vpop.f32.mrb[74].mxu1  ;;  %2538 = vmatprep.mubr.bf16.mxu0 %v2350_v30  ;;  %v3752_v62 = vadd.f32 %v2318_v14, %v4991_v35 }
 0x37a   : > { %v3753_v32 = vadd.f32 %v2320_v41, %v4988_v26  ;;  %v2322_v40 = vpop.f32.mrb[75].mxu1  ;;  %2539 = vmatmul.mubr.bf16.gmra.mrb[48].mxu0 %v2349_v38 }
 0x37b   : > { %v3754_v13 = vadd.f32 %v2322_v40, %v4991_v35  ;;  %3604 = vmatpush3.bf16.msra.mxu0 %v4082_v12 }
 0x37c   : > { %v2341_v18 = vpack.c.bf16 %v3753_v32, %v3751_v15  ;;  %3605 = vmatprep.subr.bf16.mxu0 %v4250_v16 }
 0x37d   : > { %v2342_v49 = vpack.c.bf16 %v3754_v13, %v3752_v62 }
 0x37e   : > { %v2351_v54 = vmax.bf16 %v4249_v0, %v2341_v18 }
 0x37f   : > { %v2326_v56 = vpop.f32.mrb[76].mxu1  ;;  %v2352_v53 = vmax.bf16 %v4249_v0, %v2342_v49  ;;  %3606 = vmatpush3.bf16.msra.mxu0 %v4083_v44 }
 0x380   : > { %v2328_v10 = vpop.f32.mrb[77].mxu1  ;;  %3607 = vmatprep.subr.bf16.mxu0 %v4250_v16  ;;  %v3755_v51 = vadd.f32 %v2326_v56, %v4988_v26 }
 0x381   : > { %v2330_v36 = vpop.f32.mrb[78].mxu1  ;;  %2546 = vmatprep.mubr.bf16.mxu0 %v2352_v53  ;;  %v3756_v29 = vadd.f32 %v2328_v10, %v4991_v35 }
 0x382   : > { %v3757_v9 = vadd.f32 %v2330_v36, %v4988_v26  ;;  %v2332_v7 = vpop.f32.mrb[79].mxu1  ;;  %2547 = vmatmul.mubr.bf16.gmra.mrb[52].mxu0 %v2351_v54  ;;  %v4085_v26 = vld [vmem:[%s5174_s9 + $0x38] sm:$0xff]  }
 0x383   : > { %v3758_v23 = vadd.f32 %v2332_v7, %v4991_v35  ;;  %3608 = vmatpush3.bf16.msra.mxu0 %v4084_v63  ;;  %v4086_v35 = vld [vmem:[#allocation4] sm:$0xff]   ;;  %v4095_v63 = vld [vmem:[#allocation6 + $0x8] sm:$0xff]  }
 0x384   : > { %v2343_v11 = vpack.c.bf16 %v3757_v9, %v3755_v51  ;;  %3609 = vmatprep.subr.bf16.mxu0 %v4250_v16  ;;  %3632 = vmatpush3.bf16.msra.mxu1 %v4086_v35  ;;  %v4097_v35 = vld [vmem:[#allocation6 + $0x18] sm:$0xff]  }
 0x385   : > { %v2344_v19 = vpack.c.bf16 %v3758_v23, %v3756_v29  ;;  %3633 = vmatprep.subr.bf16.mxu1 %v4250_v16 }
 0x386   : > { %v2353_v24 = vmax.bf16 %v4249_v0, %v2343_v11 }
 0x387   : > { %v2354_v21 = vmax.bf16 %v4249_v0, %v2344_v19  ;;  %3610 = vmatpush3.bf16.msra.mxu0 %v4085_v26  ;;  %v4096_v26 = vld [vmem:[#allocation6 + $0x10] sm:$0xff]  }
 0x388   : > { %3667 = vmatprep.subr.bf16.mxu0 %v4250_v16  ;;  %3634 = vmatpush3.bf16.msra.mxu1 %v4087_v39  ;;  %v4098_v39 = vld [vmem:[#allocation6 + $0x20] sm:$0xff]  }
 0x389   : > { %2554 = vmatprep.mubr.bf16.mxu0 %v2354_v21  ;;  %3635 = vmatprep.subr.bf16.mxu1 %v4250_v16  ;;  %v4093_v21 = vld [vmem:[#allocation4 + $0x38] sm:$0xff]  }
 0x38a   : > { %2555 = vmatmul.mubr.bf16.gmra.mrb[56].mxu0 %v2353_v24  ;;  %v4094_v24 = vld [vmem:[#allocation6] sm:$0xff]  }
 0x38b   : > { %3611 = vmatprep.mubr.msk.bf16.mxu0 %vm4251_vm1, %v4250_v16 }
 0x38c   : > { %3636 = vmatpush3.bf16.msra.mxu1 %v4088_v60  ;;  %v4099_v60 = vld [vmem:[#allocation6 + $0x28] sm:$0xff]  }
 0x38d   : > { %3637 = vmatprep.subr.bf16.mxu1 %v4250_v16 }
 0x390   : > { %3638 = vmatpush3.bf16.msra.mxu1 %v4089_v17  ;;  %v3379_v17 = vld [vmem:[%s5198_s22] ss:$0 sm:$0xff] }
 0x391   : > { %3639 = vmatprep.subr.bf16.mxu1 %v4250_v16 }
 0x394   : > { %3640 = vmatpush3.bf16.msra.mxu1 %v4090_v20 }
 0x395   : > { %3641 = vmatprep.subr.bf16.mxu1 %v4250_v16 }
 0x398   : > { %3642 = vmatpush3.bf16.msra.mxu1 %v4091_v3 }
 0x399   : > { %3643 = vmatprep.subr.bf16.mxu1 %v4250_v16 }
 0x39c   : > { %3644 = vmatpush3.bf16.msra.mxu1 %v4092_v5 }
 0x39d   : > { %3645 = vmatprep.subr.bf16.mxu1 %v4250_v16 }
 0x3a0   : > { %3646 = vmatpush3.bf16.msra.mxu1 %v4093_v21 }
 0x3a1   : > { %3703 = vmatprep.subr.bf16.mxu1 %v4250_v16 }
 0x43d   : > { %v3526_v22 = vpop.f32.mrb[40].mxu0 }
 0x43e   : > { %v3527_v25 = vpop.f32.mrb[41].mxu0 }
 0x43f   : > { %v3528_v27 = vadd.f32 %v3527_v25, %v3526_v22  ;;  %v3529_v28 = vpop.f32.mrb[42].mxu0 }
 0x440   : > { %v3530_v33 = vpop.f32.mrb[43].mxu0 }
 0x441   : > { %v3531_v50 = vadd.f32 %v3530_v33, %v3529_v28  ;;  %v2525_v34 = vadd.f32 %v3528_v27, %v3362_v31 }
 0x443   : > { %v2528_v37 = vadd.f32 %v3531_v50, %v3362_v31 }
 0x445   : > { %v2563_v42 = vpack.c.bf16 %v2528_v37, %v2525_v34  ;;  %v3532_v43 = vpop.f32.mrb[44].mxu0 }
 0x446   : > { %v3533_v6 = vpop.f32.mrb[45].mxu0 }
 0x447   : > { %v2568_v46 = vmax.bf16 %v4249_v0, %v2563_v42  ;;  %v3534_v47 = vadd.f32 %v3533_v6, %v3532_v43  ;;  %v3535_v8 = vpop.f32.mrb[46].mxu0 }
 0x448   : > { %v3536_v48 = vpop.f32.mrb[47].mxu0 }
 0x449   : > { %v3537_v52 = vadd.f32 %v3536_v48, %v3535_v8  ;;  %3612 = vmatmul.mubr.bf16.vlgmr.msra.gmra.mrb[60].mxu0 %v2568_v46  ;;  %v2533_v2 = vadd.f32 %v3534_v47, %v3362_v31 }
 0x44a   : > { %3615 = vmatprep.mubr.msk.bf16.mxu0 %vm4251_vm1, %v4250_v16  ;;  %3668 = vmatpush3.bf16.msra.mxu0 %v4094_v24 }
 0x44b   : > { %v2536_v55 = vadd.f32 %v3537_v52, %v3362_v31  ;;  %3669 = vmatprep.subr.bf16.mxu0 %v4250_v16 }
 0x44d   : > { %v2564_v57 = vpack.c.bf16 %v2536_v55, %v2533_v2  ;;  %v3538_v58 = vpop.f32.mrb[48].mxu0 }
 0x44e   : > { %v3539_v59 = vpop.f32.mrb[49].mxu0  ;;  %3670 = vmatpush3.bf16.msra.mxu0 %v4095_v63 }
 0x44f   : > { %v3540_v61 = vadd.f32 %v3539_v59, %v3538_v58  ;;  %v3541_v1 = vpop.f32.mrb[50].mxu0  ;;  %v2569_v4 = vmax.bf16 %v4249_v0, %v2564_v57  ;;  %3671 = vmatprep.subr.bf16.mxu0 %v4250_v16 }
 0x450   : > { %v3542_v45 = vpop.f32.mrb[51].mxu0 }
 0x451   : > { %v3543_v30 = vadd.f32 %v3542_v45, %v3541_v1  ;;  %3616 = vmatmul.mubr.bf16.gmra.mrb[64].mxu0 %v2569_v4  ;;  %v2541_v12 = vadd.f32 %v3540_v61, %v3362_v31 }
 0x452   : > { %3619 = vmatprep.mubr.msk.bf16.mxu0 %vm4251_vm1, %v4250_v16  ;;  %3672 = vmatpush3.bf16.msra.mxu0 %v4096_v26 }
 0x453   : > { %v2544_v14 = vadd.f32 %v3543_v30, %v3362_v31  ;;  %3673 = vmatprep.subr.bf16.mxu0 %v4250_v16 }
 0x455   : > { %v2565_v38 = vpack.c.bf16 %v2544_v14, %v2541_v12  ;;  %v3544_v41 = vpop.f32.mrb[52].mxu0 }
 0x456   : > { %v3545_v15 = vpop.f32.mrb[53].mxu0  ;;  %3674 = vmatpush3.bf16.msra.mxu0 %v4097_v35 }
 0x457   : > { %v3546_v32 = vadd.f32 %v3545_v15, %v3544_v41  ;;  %v3547_v40 = vpop.f32.mrb[54].mxu0  ;;  %v2570_v62 = vmax.bf16 %v4249_v0, %v2565_v38  ;;  %3675 = vmatprep.subr.bf16.mxu0 %v4250_v16 }
 0x458   : > { %v3548_v13 = vpop.f32.mrb[55].mxu0 }
 0x459   : > { %v3549_v44 = vadd.f32 %v3548_v13, %v3547_v40  ;;  %3620 = vmatmul.mubr.bf16.gmra.mrb[68].mxu0 %v2570_v62  ;;  %v2549_v18 = vadd.f32 %v3546_v32, %v3362_v31 }
 0x45a   : > { %3623 = vmatprep.mubr.msk.bf16.mxu0 %vm4251_vm1, %v4250_v16  ;;  %3676 = vmatpush3.bf16.msra.mxu0 %v4098_v39 }
 0x45b   : > { %v2552_v49 = vadd.f32 %v3549_v44, %v3362_v31  ;;  %3677 = vmatprep.subr.bf16.mxu0 %v4250_v16 }
 0x45d   : > { %v2566_v56 = vpack.c.bf16 %v2552_v49, %v2549_v18  ;;  %v3550_v53 = vpop.f32.mrb[56].mxu0  ;;  %v4100_v18 = vld [vmem:[#allocation6 + $0x30] sm:$0xff]   ;;  %v4101_v49 = vld [vmem:[#allocation6 + $0x38] sm:$0xff]  }
 0x45e   : > { %v3551_v10 = vpop.f32.mrb[57].mxu0  ;;  %3678 = vmatpush3.bf16.msra.mxu0 %v4099_v60 }
 0x45f   : > { %v3552_v54 = vadd.f32 %v3551_v10, %v3550_v53  ;;  %v3553_v36 = vpop.f32.mrb[58].mxu0  ;;  %v2571_v51 = vmax.bf16 %v4249_v0, %v2566_v56  ;;  %3679 = vmatprep.subr.bf16.mxu0 %v4250_v16  ;;  %v3388_v56 = vld [vmem:[%s5199_s17] ss:$0 sm:$0xff] }
 0x460   : > { %v3554_v9 = vpop.f32.mrb[59].mxu0 }
 0x461   : > { %v3555_v7 = vadd.f32 %v3554_v9, %v3553_v36  ;;  %3624 = vmatmul.mubr.bf16.gmra.mrb[72].mxu0 %v2571_v51  ;;  %v2557_v29 = vadd.f32 %v3552_v54, %v3362_v31 }
 0x462   : > { %3627 = vmatprep.mubr.msk.bf16.mxu0 %vm4251_vm1, %v4250_v16  ;;  %3680 = vmatpush3.bf16.msra.mxu0 %v4100_v18 }
 0x463   : > { %v2560_v23 = vadd.f32 %v3555_v7, %v3362_v31  ;;  %3681 = vmatprep.subr.bf16.mxu0 %v4250_v16 }
 0x465   : > { %v2567_v11 = vpack.c.bf16 %v2560_v23, %v2557_v29 }
 0x466   : > { %3682 = vmatpush3.bf16.msra.mxu0 %v4101_v49 }
 0x467   : > { %v2572_v19 = vmax.bf16 %v4249_v0, %v2567_v11 }
 0x469   : > { %3628 = vmatmul.mubr.bf16.gmra.mrb[76].mxu0 %v2572_v19 }
 0x46a   : > { %3683 = vmatprep.mubr.msk.bf16.mxu0 %vm4251_vm1, %v4250_v16 }
 0x51c   : > { %v2678_v20 = vpop.f32.mrb[60].mxu0 }
 0x51d   : > { %v3613_v3 = vpop.f32.mrb[61].mxu0  ;;  %v2679_v22 = vadd.f32 %v3379_v17, %v2678_v20 }
 0x51e   : > { %v2681_v5 = vpop.f32.mrb[62].mxu0 }
 0x51f   : > { %v2682_v25 = vadd.f32 %v3379_v17, %v2681_v5  ;;  %v3614_v27 = vpop.f32.mrb[63].mxu0 }
 0x521   : > { %v2717_v28 = vpack.c.bf16 %v2682_v25, %v2679_v22 }
 0x523   : > { %v2722_v31 = vmax.bf16 %v4249_v0, %v2717_v28 }
 0x524   : > { %v2686_v33 = vpop.f32.mrb[64].mxu0 }
 0x525   : > { %v3617_v50 = vpop.f32.mrb[65].mxu0  ;;  %3648 = vmatmul.mubr.bf16.vlgmr.msra.gmra.mrb[80].mxu1 %v2722_v31  ;;  %v2687_v37 = vadd.f32 %v3379_v17, %v2686_v33 }
 0x526   : > { %v2689_v34 = vpop.f32.mrb[66].mxu0  ;;  %3651 = vmatprep.mubr.msk.bf16.mxu1 %vm4251_vm1, %v4250_v16  ;;  %3711 = vmatpush3.bf16.msra.mxu1 %v4094_v24 }
 0x527   : > { %v2690_v42 = vadd.f32 %v3379_v17, %v2689_v34  ;;  %v3618_v43 = vpop.f32.mrb[67].mxu0  ;;  %3704 = vmatprep.subr.bf16.mxu1 %v4250_v16 }
 0x529   : > { %v2718_v6 = vpack.c.bf16 %v2690_v42, %v2687_v37 }
 0x52a   : > { %3712 = vmatpush3.bf16.msra.mxu1 %v4095_v63 }
 0x52b   : > { %v2723_v46 = vmax.bf16 %v4249_v0, %v2718_v6  ;;  %3705 = vmatprep.subr.bf16.mxu1 %v4250_v16 }
 0x52c   : > { %v2694_v47 = vpop.f32.mrb[68].mxu0 }
 0x52d   : > { %v3621_v8 = vpop.f32.mrb[69].mxu0  ;;  %3652 = vmatmul.mubr.bf16.gmra.mrb[84].mxu1 %v2723_v46  ;;  %v2695_v52 = vadd.f32 %v3379_v17, %v2694_v47 }
 0x52e   : > { %v2697_v48 = vpop.f32.mrb[70].mxu0  ;;  %3655 = vmatprep.mubr.msk.bf16.mxu1 %vm4251_vm1, %v4250_v16  ;;  %3713 = vmatpush3.bf16.msra.mxu1 %v4096_v26 }
 0x52f   : > { %v2698_v2 = vadd.f32 %v3379_v17, %v2697_v48  ;;  %v3622_v55 = vpop.f32.mrb[71].mxu0  ;;  %3706 = vmatprep.subr.bf16.mxu1 %v4250_v16 }
 0x531   : > { %v2719_v57 = vpack.c.bf16 %v2698_v2, %v2695_v52 }
 0x532   : > { %3714 = vmatpush3.bf16.msra.mxu1 %v4097_v35 }
 0x533   : > { %v2724_v58 = vmax.bf16 %v4249_v0, %v2719_v57  ;;  %3707 = vmatprep.subr.bf16.mxu1 %v4250_v16 }
 0x534   : > { %v2702_v59 = vpop.f32.mrb[72].mxu0 }
 0x535   : > { %v3625_v61 = vpop.f32.mrb[73].mxu0  ;;  %3656 = vmatmul.mubr.bf16.gmra.mrb[88].mxu1 %v2724_v58  ;;  %v2703_v4 = vadd.f32 %v3379_v17, %v2702_v59 }
 0x536   : > { %v2705_v1 = vpop.f32.mrb[74].mxu0  ;;  %3659 = vmatprep.mubr.msk.bf16.mxu1 %vm4251_vm1, %v4250_v16  ;;  %3715 = vmatpush3.bf16.msra.mxu1 %v4098_v39 }
 0x537   : > { %v2706_v45 = vadd.f32 %v3379_v17, %v2705_v1  ;;  %v3626_v30 = vpop.f32.mrb[75].mxu0  ;;  %3708 = vmatprep.subr.bf16.mxu1 %v4250_v16 }
 0x539   : > { %v2720_v12 = vpack.c.bf16 %v2706_v45, %v2703_v4 }
 0x53a   : > { %3716 = vmatpush3.bf16.msra.mxu1 %v4099_v60 }
 0x53b   : > { %v2725_v14 = vmax.bf16 %v4249_v0, %v2720_v12  ;;  %3709 = vmatprep.subr.bf16.mxu1 %v4250_v16 }
 0x53c   : > { %v2710_v38 = vpop.f32.mrb[76].mxu0 }
 0x53d   : > { %v3629_v41 = vpop.f32.mrb[77].mxu0  ;;  %3660 = vmatmul.mubr.bf16.gmra.mrb[92].mxu1 %v2725_v14  ;;  %v2711_v32 = vadd.f32 %v3379_v17, %v2710_v38 }
 0x53e   : > { %v2713_v15 = vpop.f32.mrb[78].mxu0  ;;  %3663 = vmatprep.mubr.msk.bf16.mxu1 %vm4251_vm1, %v4250_v16  ;;  %3717 = vmatpush3.bf16.msra.mxu1 %v4100_v18 }
 0x53f   : > { %v2714_v40 = vadd.f32 %v3379_v17, %v2713_v15  ;;  %v3630_v62 = vpop.f32.mrb[79].mxu0  ;;  %3710 = vmatprep.subr.bf16.mxu1 %v4250_v16 }
 0x541   : > { %v2721_v13 = vpack.c.bf16 %v2714_v40, %v2711_v32 }
 0x542   : > { %3718 = vmatpush3.bf16.msra.mxu1 %v4101_v49 }
 0x543   : > { %v2726_v44 = vmax.bf16 %v4249_v0, %v2721_v13 }
 0x545   : > { %3664 = vmatmul.mubr.bf16.gmra.mrb[96].mxu1 %v2726_v44 }
 0x546   : > { %3699 = vmatprep.mubr.msk.bf16.mxu1 %vm4251_vm1, %v4250_v16 }
 0x5f8   : > { %v2832_v53 = vpop.f32.mrb[80].mxu1 }
 0x5f9   : > { %v3649_v10 = vpop.f32.mrb[81].mxu1  ;;  %v2833_v36 = vadd.f32 %v3388_v56, %v2832_v53 }
 0x5fa   : > { %v2835_v54 = vpop.f32.mrb[82].mxu1 }
 0x5fb   : > { %v2836_v51 = vadd.f32 %v3388_v56, %v2835_v54  ;;  %v3650_v9 = vpop.f32.mrb[83].mxu1 }
 0x5fd   : > { %v2871_v7 = vpack.c.bf16 %v2836_v51, %v2833_v36 }
 0x5ff   : > { %v2876_v29 = vmax.bf16 %v4249_v0, %v2871_v7 }
 0x600   : > { %v2840_v23 = vpop.f32.mrb[84].mxu1 }
 0x601   : > { %v3653_v11 = vpop.f32.mrb[85].mxu1  ;;  %3684 = vmatmul.mubr.bf16.vlgmr.msra.gmra.mrb[80].mxu0 %v2876_v29  ;;  %v2841_v21 = vadd.f32 %v3388_v56, %v2840_v23 }
 0x602   : > { %v2843_v19 = vpop.f32.mrb[86].mxu1  ;;  %3687 = vmatprep.mubr.msk.bf16.mxu0 %vm4251_vm1, %v4250_v16 }
 0x603   : > { %v2844_v24 = vadd.f32 %v3388_v56, %v2843_v19  ;;  %v3654_v63 = vpop.f32.mrb[87].mxu1 }
 0x605   : > { %v2872_v26 = vpack.c.bf16 %v2844_v24, %v2841_v21 }
 0x607   : > { %v2877_v35 = vmax.bf16 %v4249_v0, %v2872_v26 }
 0x608   : > { %v2848_v39 = vpop.f32.mrb[88].mxu1 }
 0x609   : > { %v3657_v60 = vpop.f32.mrb[89].mxu1  ;;  %3688 = vmatmul.mubr.bf16.gmra.mrb[84].mxu0 %v2877_v35  ;;  %v2849_v20 = vadd.f32 %v3388_v56, %v2848_v39 }
 0x60a   : > { %v2851_v17 = vpop.f32.mrb[90].mxu1  ;;  %3691 = vmatprep.mubr.msk.bf16.mxu0 %vm4251_vm1, %v4250_v16 }
 0x60b   : > { %v2852_v3 = vadd.f32 %v3388_v56, %v2851_v17  ;;  %v3658_v5 = vpop.f32.mrb[91].mxu1 }
 0x60d   : > { %v2873_v22 = vpack.c.bf16 %v2852_v3, %v2849_v20 }
 0x60f   : > { %v2878_v25 = vmax.bf16 %v4249_v0, %v2873_v22 }
 0x610   : > { %v2856_v27 = vpop.f32.mrb[92].mxu1 }
 0x611   : > { %v3661_v28 = vpop.f32.mrb[93].mxu1  ;;  %3692 = vmatmul.mubr.bf16.gmra.mrb[88].mxu0 %v2878_v25  ;;  %v2857_v33 = vadd.f32 %v3388_v56, %v2856_v27 }
 0x612   : > { %v2859_v31 = vpop.f32.mrb[94].mxu1  ;;  %3695 = vmatprep.mubr.msk.bf16.mxu0 %vm4251_vm1, %v4250_v16  ;;  %v5134_v16 = vld [vmem:[%s5200_s29] ss:$0 sm:$0xff] }
 0x613   : > { %v2860_v50 = vadd.f32 %v3388_v56, %v2859_v31  ;;  %v3662_v34 = vpop.f32.mrb[95].mxu1 }
 0x615   : > { %v2874_v37 = vpack.c.bf16 %v2860_v50, %v2857_v33 }
 0x617   : > { %v2879_v42 = vmax.bf16 %v4249_v0, %v2874_v37 }
 0x618   : > { %v2864_v43 = vpop.f32.mrb[96].mxu1 }
 0x619   : > { %v3665_v6 = vpop.f32.mrb[97].mxu1  ;;  %3696 = vmatmul.mubr.bf16.gmra.mrb[92].mxu0 %v2879_v42  ;;  %v2865_v47 = vadd.f32 %v3388_v56, %v2864_v43 }
 0x61a   : > { %v2867_v46 = vpop.f32.mrb[98].mxu1 }
 0x61b   : > { %v2868_v8 = vadd.f32 %v3388_v56, %v2867_v46  ;;  %v3666_v48 = vpop.f32.mrb[99].mxu1 }
 0x61d   : > { %v2875_v52 = vpack.c.bf16 %v2868_v8, %v2865_v47 }
 0x61f   : > { %v2880_v2 = vmax.bf16 %v4249_v0, %v2875_v52 }
 0x621   : > { %3700 = vmatmul.mubr.bf16.vlgmr.msra.gmra.mrb[100].mxu1 %v2880_v2 }
 0x6d4   : > { %v2986_v55 = vpop.f32.mrb[80].mxu0 }
 0x6d5   : > { %v2987_v57 = vadd.f32 %v5134_v16, %v2986_v55  ;;  %v3685_v58 = vpop.f32.mrb[81].mxu0 }
 0x6d6   : > { %v2989_v59 = vpop.f32.mrb[82].mxu0 }
 0x6d7   : > { %v3406_v61 = vmul.f32 -1.442695, %v2987_v57  ;;  %v2990_v1 = vadd.f32 %v5134_v16, %v2989_v59  ;;  %v3686_v4 = vpop.f32.mrb[83].mxu0 }
 0x6d9   : > { %4102 = vpow2.f32 %v3406_v61  ;;  %v3407_v45 = vmul.f32 -1.442695, %v2990_v1 }
 0x6db   : > { %4104 = vpow2.f32 %v3407_v45 }
 0x6dc   : > { %v2994_v30 = vpop.f32.mrb[84].mxu0 }
 0x6dd   : > { %v2995_v0 = vadd.f32 %v5134_v16, %v2994_v30  ;;  %v3689_v12 = vpop.f32.mrb[85].mxu0 }
 0x6de   : > { %v2997_v14 = vpop.f32.mrb[86].mxu0 }
 0x6df   : > { %v3408_v38 = vmul.f32 -1.442695, %v2995_v0  ;;  %v2998_v41 = vadd.f32 %v5134_v16, %v2997_v14  ;;  %v3690_v15 = vpop.f32.mrb[87].mxu0 }
 0x6e1   : > { %4106 = vpow2.f32 %v3408_v38  ;;  %v3409_v32 = vmul.f32 -1.442695, %v2998_v41 }
 0x6e3   : > { %v4103_v40 = vpop.eup %4102  ;;  %4108 = vpow2.f32 %v3409_v32 }
 0x6e4   : > { %v3055_v62 = vadd.f32 1.0, %v4103_v40  ;;  %v3002_v13 = vpop.f32.mrb[88].mxu0 }
 0x6e5   : > { %v4105_v44 = vpop.eup %4104  ;;  %v3003_v18 = vadd.f32 %v5134_v16, %v3002_v13  ;;  %v3693_v49 = vpop.f32.mrb[89].mxu0 }
 0x6e6   : > { %4110 = vrcp.f32 %v3055_v62  ;;  %v3056_v56 = vadd.f32 1.0, %v4105_v44  ;;  %v3005_v53 = vpop.f32.mrb[90].mxu0 }
 0x6e7   : > { %v3410_v10 = vmul.f32 -1.442695, %v3003_v18  ;;  %v3006_v54 = vadd.f32 %v5134_v16, %v3005_v53  ;;  %v3694_v36 = vpop.f32.mrb[91].mxu0 }
 0x6e8   : > { %4112 = vrcp.f32 %v3056_v56 }
 0x6e9   : > { %4114 = vpow2.f32 %v3410_v10  ;;  %v3411_v51 = vmul.f32 -1.442695, %v3006_v54 }
 0x6eb   : > { %v4107_v9 = vpop.eup %4106  ;;  %4116 = vpow2.f32 %v3411_v51 }
 0x6ec   : > { %v3057_v7 = vadd.f32 1.0, %v4107_v9  ;;  %v3010_v29 = vpop.f32.mrb[92].mxu0 }
 0x6ed   : > { %v4109_v23 = vpop.eup %4108  ;;  %v3011_v11 = vadd.f32 %v5134_v16, %v3010_v29  ;;  %v3697_v19 = vpop.f32.mrb[93].mxu0 }
 0x6ee   : > { %4118 = vrcp.f32 %v3057_v7  ;;  %v3058_v21 = vadd.f32 1.0, %v4109_v23  ;;  %v3013_v24 = vpop.f32.mrb[94].mxu0 }
 0x6ef   : > { %v3412_v63 = vmul.f32 -1.442695, %v3011_v11  ;;  %v3014_v26 = vadd.f32 %v5134_v16, %v3013_v24  ;;  %v3698_v35 = vpop.f32.mrb[95].mxu0 }
 0x6f0   : > { %v4111_v39 = vpop.eup %4110  ;;  %4120 = vrcp.f32 %v3058_v21 }
 0x6f1   : > { %3085 = vst [vmem:[%s5147_s14] sm:$0xff] %v4111_v39  ;;  %4122 = vpow2.f32 %v3412_v63  ;;  %v3413_v60 = vmul.f32 -1.442695, %v3014_v26 }
 0x6f2   : > { %v4113_v17 = vpop.eup %4112 }
 0x6f3   : > { %v4115_v20 = vpop.eup %4114  ;;  %3086 = vst [vmem:[%s5147_s14 + $0x8] sm:$0xff] %v4113_v17  ;;  %4124 = vpow2.f32 %v3413_v60 }
 0x6f4   : > { %v3059_v3 = vadd.f32 1.0, %v4115_v20  ;;  %v3018_v5 = vpop.f32.mrb[100].mxu1 }
 0x6f5   : > { %v4117_v22 = vpop.eup %4116  ;;  %v3019_v25 = vadd.f32 %v5134_v16, %v3018_v5  ;;  %v3701_v27 = vpop.f32.mrb[101].mxu1 }
 0x6f6   : > { %4126 = vrcp.f32 %v3059_v3  ;;  %v3060_v28 = vadd.f32 1.0, %v4117_v22  ;;  %v3021_v31 = vpop.f32.mrb[102].mxu1 }
 0x6f7   : > { %v3414_v33 = vmul.f32 -1.442695, %v3019_v25  ;;  %v3022_v50 = vadd.f32 %v5134_v16, %v3021_v31  ;;  %v3702_v34 = vpop.f32.mrb[103].mxu1 }
 0x6f8   : > { %v4119_v37 = vpop.eup %4118  ;;  %4128 = vrcp.f32 %v3060_v28 }
 0x6f9   : > { %3087 = vst [vmem:[%s5147_s14 + $0x10] sm:$0xff] %v4119_v37  ;;  %4130 = vpow2.f32 %v3414_v33  ;;  %v3415_v42 = vmul.f32 -1.442695, %v3022_v50 }
 0x6fa   : > { %v4121_v43 = vpop.eup %4120 }
 0x6fb   : > { %v4123_v6 = vpop.eup %4122  ;;  %3088 = vst [vmem:[%s5147_s14 + $0x18] sm:$0xff] %v4121_v43  ;;  %4132 = vpow2.f32 %v3415_v42 }
 0x6fc   : > { %v3061_v46 = vadd.f32 1.0, %v4123_v6 }
 0x6fd   : > { %v4125_v47 = vpop.eup %4124 }
 0x6fe   : > { %4134 = vrcp.f32 %v3061_v46  ;;  %v3062_v8 = vadd.f32 1.0, %v4125_v47 }
 0x700   : > { %v4127_v48 = vpop.eup %4126  ;;  %4136 = vrcp.f32 %v3062_v8 }
 0x701   : > { %3089 = vst [vmem:[%s5147_s14 + $0x20] sm:$0xff] %v4127_v48 }
 0x702   : > { %v4129_v52 = vpop.eup %4128 }
 0x703   : > { %v4131_v2 = vpop.eup %4130  ;;  %3090 = vst [vmem:[%s5147_s14 + $0x28] sm:$0xff] %v4129_v52 }
 0x704   : > { %v3063_v16 = vadd.f32 1.0, %v4131_v2 }
 0x705   : > { %v4133_v55 = vpop.eup %4132 }
 0x706   : > { %4138 = vrcp.f32 %v3063_v16  ;;  %v3064_v57 = vadd.f32 1.0, %v4133_v55 }
 0x708   : > { %v4135_v58 = vpop.eup %4134  ;;  %4140 = vrcp.f32 %v3064_v57 }
 0x709   : > { %3091 = vst [vmem:[%s5147_s14 + $0x30] sm:$0xff] %v4135_v58 }
 0x70a   : > { %v4137_v59 = vpop.eup %4136 }
 0x70b   : > { %3092 = vst [vmem:[%s5147_s14 + $0x38] sm:$0xff] %v4137_v59 }
 0x710   : > { %v4139_v61 = vpop.eup %4138 }
 0x711   : > { %3093 = vst [vmem:[%s5147_s14 + $0x40] sm:$0xff] %v4139_v61 }
 0x712   : > { %v4141_v1 = vpop.eup %4140 }
 0x713   : > { %3094 = vst [vmem:[%s5147_s14 + $0x48] sm:$0xff] %v4141_v1 }
 0x714 PF: > { %s27_s18 = sadd.s32 1, %s4240_s18  }
 0x715   : > { %p24_p3 = scmp.ge.s32.totalorder %s27_s18, 6  }
 0x717   :  { %26 = sbr.rel (!%p24_p3) target bundleno = 7 (0x7), region = 123 }
 0x71e   :  { %3117 = vsyncpa [#allocation3], 1 }
 0x71f   :  { %3119 = vsyncpa [#allocation3 + $0x1], 1 }
 0x720   :  { %3120 = vsyncpa [#allocation5], 1 }

</bundles_post_ra>
